<compile_context>
chip_gen: v7x
topology: tpu7x:2x2x1
jax: 0.10.0
libtpu: 0.0.40
codegen_flags: <defaults>
</compile_context>

<pallas_src>
import math
import functools
import jax
import jax.numpy as jnp
from jax.experimental import pallas as pl
from jax.experimental.pallas import tpu as pltpu


# ----------------------------------------------------------------------------
# Fused Pallas kernel (one grid step == NB batch elements)
# ----------------------------------------------------------------------------
def _fused_forward_kernel(pts_ref, eps_ref,
                          we_ref, aw_ref, ab_ref, ln_ref,
                          wuv_ref, buv_ref, wd_ref, bd_ref,
                          wt_ref, bt_ref,
                          mulv_ref, occ_ref):
    NB, Tot, _ = pts_ref.shape
    C = we_ref.shape[1]
    R = wd_ref.shape[0]
    F = eps_ref.shape[1]
    Mq = occ_ref.shape[2]
    M = Tot - F - Mq
    layers = aw_ref.shape[0] - 2            # encoder + decoder*layers + rbf
    cdt = we_ref.dtype                      # MXU compute dtype (f32 or bf16)
    scale = float(C) ** -0.5

    def attention(blk, xq, ykv, self_attn):
        """Attention block `blk`: fused-QKV projection -> softmax(q k^T/sqrt(C)) v
           -> out-proj -> residual -> LayerNorm.  Weights live in one lane-dense
           [C, 4C] VMEM tile (wq|wk|wv|wp), biases in one [1, 4C] row."""
        w4 = aw_ref[blk]                    # [C, 4C]  (compute dtype)
        b4 = ab_ref[blk]                    # [1, 4C]  (f32)
        ln = ln_ref[blk]                    # [2, C]   (f32)
        gamma, beta = ln[0:1, :], ln[1:2, :]
        Mx = xq.shape[1]
        Nk = ykv.shape[1]

        if self_attn:                       # one [rows, C] @ [C, 3C] matmul
            qkv = (jnp.dot(xq.reshape(NB * Mx, C).astype(cdt), w4[:, 0:3 * C],
                           preferred_element_type=jnp.float32)
                   + b4[:, 0:3 * C]).reshape(NB, Mx, 3 * C)
            q = qkv[:, :, 0:C]
            k = qkv[:, :, C:2 * C]
            v = qkv[:, :, 2 * C:3 * C]
        else:                               # q alone + fused k|v
            q = (jnp.dot(xq.reshape(NB * Mx, C).astype(cdt), w4[:, 0:C],
                         preferred_element_type=jnp.float32)
                 + b4[:, 0:C]).reshape(NB, Mx, C)
            kv = (jnp.dot(ykv.reshape(NB * Nk, C).astype(cdt), w4[:, C:3 * C],
                          preferred_element_type=jnp.float32)
                  + b4[:, C:3 * C]).reshape(NB, Nk, 2 * C)
            k = kv[:, :, 0:C]
            v = kv[:, :, C:2 * C]

        # q @ k^T without materializing a transpose (batched, contract last axes).
        s = jnp.einsum('bqc,bkc->bqk', q.astype(cdt), k.astype(cdt),
                       preferred_element_type=jnp.float32) * scale
        s = s - jnp.max(s, axis=-1, keepdims=True)
        p = jnp.exp(s)
        # Softmax denominator on the EUP slot (approx reciprocal, inference-grade).
        p = p * pl.reciprocal(jnp.sum(p, axis=-1, keepdims=True), approx=True)

        h = jnp.einsum('bqk,bkc->bqc', p.astype(cdt), v.astype(cdt),
                       preferred_element_type=jnp.float32)
        h = (jnp.dot(h.reshape(NB * Mx, C).astype(cdt), w4[:, 3 * C:4 * C],
                     preferred_element_type=jnp.float32)
             + b4[:, 3 * C:4 * C]).reshape(NB, Mx, C)

        r = xq + h                                                  # residual (f32)
        mean = jnp.mean(r, axis=-1, keepdims=True)
        var = jnp.mean((r - mean) ** 2, axis=-1, keepdims=True)
        r = (r - mean) * jax.lax.rsqrt(var + 1e-5)                  # LN stats in f32
        return r * gamma + beta

    # --- one fused embedding matmul for samples | FPS picks | query points ---
    pts = pts_ref[...].astype(cdt)                                  # [NB, Tot, 3]
    emb = jnp.dot(pts.reshape(NB * Tot, 3), we_ref[...],
                  preferred_element_type=jnp.float32).reshape(NB, Tot, C)
    embed = emb[:, 0:M, :]                                          # [NB, M, C]
    pnts = emb[:, M:M + F, :]                                       # [NB, F, C]
    q_embed = emb[:, M + F:Tot, :]                                  # [NB, Mq, C]

    # --- encoder cross-attention ---
    feats = attention(0, pnts, embed, self_attn=False)

    # --- VAE: fused mu|logvar projection, reparameterize, decode ---
    muv = (jnp.dot(feats.reshape(NB * F, C).astype(cdt), wuv_ref[...],
                   preferred_element_type=jnp.float32)
           + buv_ref[...]).reshape(NB, F, 2 * R)
    mulv_ref[...] = muv                              # one lane-dense [NB, F, 2R] store
    mu = muv[:, :, 0:R]
    lv = muv[:, :, R:2 * R]
    z = eps_ref[...] * jnp.exp(0.5 * lv) + mu                       # reparameterize
    feats = (jnp.dot(z.reshape(NB * F, R).astype(cdt), wd_ref[...],
                     preferred_element_type=jnp.float32)
             + bd_ref[...]).reshape(NB, F, C)

    # --- decoder self-attention layers ---
    # TODO(synk): switch to lax.fori_loop with dynamic block indexing if `layers`
    # grows much past 2 (static unroll does not bound vreg live ranges).
    for l in range(layers):
        feats = attention(1 + l, feats, feats, self_attn=True)

    # --- radial-basis cross-attention + occupancy head ---
    q_out = attention(1 + layers, q_embed, feats, self_attn=False)

    # Occupancy emitted lane-dense as [NB, 1, Mq] (one Mq-lane row per batch)
    # instead of an [Mq, 1] column of masked single-lane stores.
    wtb = jnp.broadcast_to(wt_ref[...], (NB, 1, C)).astype(cdt)
    occ = jnp.einsum('boc,bmc->bom', wtb, q_out.astype(cdt),
                     preferred_element_type=jnp.float32) + bt_ref[...]
    occ_ref[...] = 0.5 * jnp.tanh(occ) + 0.5


# ----------------------------------------------------------------------------
# Pallas wrapper
# ----------------------------------------------------------------------------
def fused_forward(params, x, x_sel, q, eps, *, batch_block=None,
                  mxu_dtype=jnp.float32):
    B, M, _ = x.shape
    F = x_sel.shape[1]
    Mq = q.shape[1]
    C = params["embed_w"].shape[1]
    R = params["vae"]["wu"].shape[1]
    layers = len(params["decoder"])
    Tot = M + F + Mq
    cdt = mxu_dtype

    NB = B if batch_block is None else int(batch_block)
    if NB <= 0 or B % NB != 0:
        NB = 1

    # One fused per-batch point tensor: rows [0:M]=samples, [M:M+F]=FPS picks,
    # [M+F:]=query points -> one embedding matmul / one input DMA in-kernel.
    pts_all = jnp.concatenate([x, x_sel, q], axis=1)                 # [B, Tot, 3]

    blocks = [params["encoder"]] + list(params["decoder"]) + [params["rbf"]]
    # Lane-dense fused attention weights: [nblk, C, 4C] = wq|wk|wv|wp (C_in, C_out).
    aw = jnp.stack([jnp.concatenate([p["wq"], p["wk"], p["wv"], p["wp"]], axis=1)
                    for p in blocks]).astype(cdt)
    # Fused biases [nblk, 1, 4C] = bq|bk|bv|bp and LayerNorm params [nblk, 2, C].
    ab = jnp.stack([jnp.concatenate([p["bq"], p["bk"], p["bv"], p["bp"]])[None, :]
                    for p in blocks])
    ln = jnp.stack([jnp.stack([p["gamma"], p["beta"]]) for p in blocks])

    wuv = jnp.concatenate([params["vae"]["wu"], params["vae"]["wv"]], axis=1).astype(cdt)
    buv = jnp.concatenate([params["vae"]["bu"], params["vae"]["bv"]])[None, :]
    wd = params["vae"]["wd"].astype(cdt)
    bd = params["vae"]["bd"][None, :]
    wt = params["transform_w"].reshape(1, C).astype(cdt)
    bt = params["transform_b"].reshape(1, 1)
    we = params["embed_w"].astype(cdt)

    def const_spec(arr):
        return pl.BlockSpec(arr.shape, lambda b, _n=arr.ndim: (0,) * _n)

    def per_b(tail):
        return pl.BlockSpec((NB,) + tail, lambda b: (b, 0, 0))

    mulv, occ = pl.pallas_call(
        _fused_forward_kernel,
        out_shape=(jax.ShapeDtypeStruct((B, F, 2 * R), jnp.float32),
                   jax.ShapeDtypeStruct((B, 1, Mq), jnp.float32)),
        grid=(B // NB,),
        in_specs=[per_b((Tot, 3)),            # fused points (samples|picks|queries)
                  per_b((F, R)),              # reparameterization noise
                  const_spec(we),             # embedding weight           [3, C]
                  const_spec(aw),             # fused attention weights    [nblk, C, 4C]
                  const_spec(ab),             # fused attention biases     [nblk, 1, 4C]
                  const_spec(ln),             # LayerNorm gamma/beta       [nblk, 2, C]
                  const_spec(wuv), const_spec(buv),   # VAE mu|logvar proj [C,2R]/[1,2R]
                  const_spec(wd), const_spec(bd),     # VAE decode proj    [R,C]/[1,C]
                  const_spec(wt), const_spec(bt)],    # occupancy head     [1,C]/[1,1]
        out_specs=(per_b((F, 2 * R)), per_b((1, Mq))),
        compiler_params=pltpu.CompilerParams(dimension_semantics=("parallel",)),
        # TODO(synk): at production M/Mq add an Mq-tiling grid axis for the RBF
        # stage (feats stays resident) and an explicit vmem_limit_bytes for
        # v7x's 64 MiB VMEM; unnecessary at these sizes (<1 MiB resident).
    )(pts_all, eps, we, aw, ab, ln, wuv, buv, wd, bd, wt, bt)

    mu = mulv[..., :R]
    logvar = mulv[..., R:]
    return mu, logvar, occ.reshape(B, Mq)


def _device_defaults():
    """Pick (batch_block, mxu_dtype) from the local TPU generation.
    v7x (2 TensorCores): keep a per-batch "parallel" grid + bf16 MXU inputs.
    v6e (1 TC, native bf16): fold the whole batch into one grid step + bf16.
    v5e / unknown: fold the batch, keep f32 matmuls (no bf16 VPU on v5e)."""
    try:
        kind = jax.devices()[0].device_kind.lower()
    except Exception:
        kind = ""
    if "v7" in kind:
        return 1, jnp.bfloat16
    if "v6" in kind:
        return None, jnp.bfloat16
    return None, jnp.float32


# ----------------------------------------------------------------------------
# Plain-JAX glue
# ----------------------------------------------------------------------------
def farthest_point_sampler(x, n):
    """x: [B, M, 3] -> indices [B, n] (iterative FPS)."""
    # TODO(synk): dgl's farthest_point_sampler picks a random start point; we
    # deterministically start from index 0 (sequential data-dependent argmax
    # loop stays in plain JAX — it has no clean Pallas equivalent).
    B, M, _ = x.shape

    def one(pts):
        def body(i, carry):
            idxs, dists = carry
            last = pts[idxs[i - 1]]
            d = jnp.sum((pts - last) ** 2, axis=-1)
            dists = jnp.minimum(dists, d)
            idxs = idxs.at[i].set(jnp.argmax(dists).astype(jnp.int32))
            return idxs, dists

        idxs0 = jnp.zeros((n,), jnp.int32)
        dists0 = jnp.full((M,), jnp.inf, jnp.float32)
        idxs, _ = jax.lax.fori_loop(1, n, body, (idxs0, dists0))
        return idxs

    return jax.vmap(one)(x)


def xavier(key, fan_out, fan_in, gain=1.0):
    a = gain * math.sqrt(6.0 / (fan_in + fan_out))
    w = jax.random.uniform(key, (fan_out, fan_in), jnp.float32, -a, a)
    return w.T  # stored as [in, out]


def init_attention(key, C):
    ks = jax.random.split(key, 4)
    return dict(
        wq=xavier(ks[0], C, C), wk=xavier(ks[1], C, C), wv=xavier(ks[2], C, C),
        wp=xavier(ks[3], C, C, gain=1e-5),
        bq=jnp.zeros((C,), jnp.float32), bk=jnp.zeros((C,), jnp.float32),
        bv=jnp.zeros((C,), jnp.float32), bp=jnp.zeros((C,), jnp.float32),
        gamma=jnp.ones((C,), jnp.float32), beta=jnp.zeros((C,), jnp.float32),
    )


def init_params(key, features, channels, layers, reg_channels):
    keys = jax.random.split(key, 7 + layers)
    return dict(
        embed_w=xavier(keys[0], channels, 3),                 # [3, C], no bias
        encoder=init_attention(keys[1], channels),
        vae=dict(
            wu=xavier(keys[2], reg_channels, channels), bu=jnp.zeros((reg_channels,), jnp.float32),
            wv=xavier(keys[3], reg_channels, channels), bv=jnp.zeros((reg_channels,), jnp.float32),
            wd=xavier(keys[4], channels, reg_channels), bd=jnp.zeros((channels,), jnp.float32),
        ),
        decoder=[init_attention(keys[5 + i], channels) for i in range(layers)],
        rbf=init_attention(keys[5 + layers], channels),
        transform_w=xavier(keys[6 + layers], 1, channels),     # [C, 1]
        transform_b=jnp.zeros((1,), jnp.float32),
    )


@functools.partial(jax.jit, static_argnames=("features",))
def shape_autoencoder_forward(params, x, q, eps_key, features):
    """x: [B, M, 3] samples, q: [B, Mq, 3] query points."""
    B = x.shape[0]
    R = params["vae"]["wu"].shape[1]
    batch_block, mxu_dtype = _device_defaults()

    idxs = farthest_point_sampler(x, features)                      # [B, F]
    # embed(x)[idxs] == embed(x[idxs]) because the embedding is a bias-free
    # row-wise linear map — gather the raw 3-D points here so the embedded
    # activations never round-trip through HBM.
    x_sel = jnp.take_along_axis(x, idxs[:, :, None], axis=1)        # [B, F, 3]
    eps = jax.random.normal(eps_key, (B, features, R), jnp.float32)

    mu, logvar, occ = fused_forward(params, x, x_sel, q, eps,
                                    batch_block=batch_block, mxu_dtype=mxu_dtype)
    return {"regularize_mu": mu, "regularize_var": logvar, "occupancy": occ}


# ----------------------------------------------------------------------------
if __name__ == "__main__":
    B, M, Mq = 2, 64, 16
    features, channels, layers, reg_channels = 8, 32, 2, 16

    key = jax.random.PRNGKey(0)
    kp, kx, kq, keps = jax.random.split(key, 4)

    params = init_params(kp, features, channels, layers, reg_channels)
    x = jax.random.normal(kx, (B, M, 3), jnp.float32)
    q = jax.random.normal(kq, (B, Mq, 3), jnp.float32)

    out = shape_autoencoder_forward(params, x, q, keps, features)
    out = jax.tree_util.tree_map(jax.block_until_ready, out)

    assert out["occupancy"].shape == (B, Mq)
    assert out["regularize_mu"].shape == (B, features, reg_channels)
    assert out["regularize_var"].shape == (B, features, reg_channels)
    assert bool(jnp.all(jnp.isfinite(out["occupancy"])))
    assert bool(jnp.all(jnp.isfinite(out["regularize_mu"])))
    print("KERNEL_OK")
</pallas_src>

<mosaic_0001>
module attributes {stable_mosaic.version = 11 : i64} {
  func.func @_fused_forward_kernel(%arg0: i32, %arg1: memref<2x88x3xf32, #tpu.memory_space<vmem>>, %arg2: memref<2x8x16xf32, #tpu.memory_space<vmem>>, %arg3: memref<3x32xf32, #tpu.memory_space<vmem>>, %arg4: memref<4x32x128xf32, #tpu.memory_space<vmem>>, %arg5: memref<4x1x128xf32, #tpu.memory_space<vmem>>, %arg6: memref<4x2x32xf32, #tpu.memory_space<vmem>>, %arg7: memref<32x32xf32, #tpu.memory_space<vmem>>, %arg8: memref<1x32xf32, #tpu.memory_space<vmem>>, %arg9: memref<16x32xf32, #tpu.memory_space<vmem>>, %arg10: memref<1x32xf32, #tpu.memory_space<vmem>>, %arg11: memref<1x32xf32, #tpu.memory_space<vmem>>, %arg12: memref<1x1xf32, #tpu.memory_space<vmem>>, %arg13: memref<2x8x32xf32, #tpu.memory_space<vmem>>, %arg14: memref<2x1x16xf32, #tpu.memory_space<vmem>>) attributes {dimension_semantics = [#tpu.dimension_semantics<parallel>], iteration_bounds = array<i64: 1>, scalar_prefetch = 0 : i64, scratch_operands = 0 : i64, tpu.core_type = #tpu.core_type<tc>, window_params = [{transform_indices = @transform_0, window_bounds = array<i64: 2, 88, 3>}, {transform_indices = @transform_1, window_bounds = array<i64: 2, 8, 16>}, {pipeline_mode = #tpu.pipeline_mode<synchronous>, transform_indices = @transform_2, window_bounds = array<i64: 3, 32>}, {pipeline_mode = #tpu.pipeline_mode<synchronous>, transform_indices = @transform_3, window_bounds = array<i64: 4, 32, 128>}, {pipeline_mode = #tpu.pipeline_mode<synchronous>, transform_indices = @transform_4, window_bounds = array<i64: 4, 1, 128>}, {pipeline_mode = #tpu.pipeline_mode<synchronous>, transform_indices = @transform_5, window_bounds = array<i64: 4, 2, 32>}, {pipeline_mode = #tpu.pipeline_mode<synchronous>, transform_indices = @transform_6, window_bounds = array<i64: 32, 32>}, {pipeline_mode = #tpu.pipeline_mode<synchronous>, transform_indices = @transform_7, window_bounds = array<i64: 1, 32>}, {pipeline_mode = #tpu.pipeline_mode<synchronous>, transform_indices = @transform_8, window_bounds = array<i64: 16, 32>}, {pipeline_mode = #tpu.pipeline_mode<synchronous>, transform_indices = @transform_9, window_bounds = array<i64: 1, 32>}, {pipeline_mode = #tpu.pipeline_mode<synchronous>, transform_indices = @transform_10, window_bounds = array<i64: 1, 32>}, {pipeline_mode = #tpu.pipeline_mode<synchronous>, transform_indices = @transform_11, window_bounds = array<i64: 1, 1>}, {transform_indices = @transform_12, window_bounds = array<i64: 2, 8, 32>}, {transform_indices = @transform_13, window_bounds = array<i64: 2, 1, 16>}]} {
    %c0 = arith.constant 0 : index
    %c0_0 = arith.constant 0 : index
    %c0_1 = arith.constant 0 : index
    %0 = vector.load %arg1[%c0, %c0_0, %c0_1] : memref<2x88x3xf32, #tpu.memory_space<vmem>>, vector<2x88x3xf32>
    %1 = vector.shape_cast %0 : vector<2x88x3xf32> to vector<176x3xf32>
    %c0_2 = arith.constant 0 : index
    %c0_3 = arith.constant 0 : index
    %2 = vector.load %arg3[%c0_2, %c0_3] : memref<3x32xf32, #tpu.memory_space<vmem>>, vector<3x32xf32>
    %cst = arith.constant dense<0.000000e+00> : vector<176x32xf32>
    %3 = tpu.matmul %1, %2, %cst {dimension_numbers = #tpu.dot_dimension_numbers<[1], [0], [0], [1], [0, 0, 1, 1], [], []>} : vector<176x3xf32>, vector<3x32xf32>, vector<176x32xf32> -> vector<176x32xf32>
    %4 = vector.shape_cast %3 : vector<176x32xf32> to vector<2x88x32xf32>
    %5 = vector.extract_strided_slice %4 {offsets = [0, 0, 0], sizes = [2, 64, 32], strides = [1, 1, 1]} : vector<2x88x32xf32> to vector<2x64x32xf32>
    %6 = vector.extract_strided_slice %4 {offsets = [0, 64, 0], sizes = [2, 8, 32], strides = [1, 1, 1]} : vector<2x88x32xf32> to vector<2x8x32xf32>
    %7 = vector.extract_strided_slice %4 {offsets = [0, 72, 0], sizes = [2, 16, 32], strides = [1, 1, 1]} : vector<2x88x32xf32> to vector<2x16x32xf32>
    %c0_4 = arith.constant 0 : index
    %c0_5 = arith.constant 0 : index
    %c0_6 = arith.constant 0 : index
    %8 = vector.load %arg4[%c0_4, %c0_5, %c0_6] : memref<4x32x128xf32, #tpu.memory_space<vmem>>, vector<1x32x128xf32>
    %9 = vector.shape_cast %8 : vector<1x32x128xf32> to vector<32x128xf32>
    %c0_7 = arith.constant 0 : index
    %c0_8 = arith.constant 0 : index
    %c0_9 = arith.constant 0 : index
    %10 = vector.load %arg5[%c0_7, %c0_8, %c0_9] : memref<4x1x128xf32, #tpu.memory_space<vmem>>, vector<1x1x128xf32>
    %11 = vector.shape_cast %10 : vector<1x1x128xf32> to vector<1x128xf32>
    %c0_10 = arith.constant 0 : index
    %c0_11 = arith.constant 0 : index
    %c0_12 = arith.constant 0 : index
    %12 = vector.load %arg6[%c0_10, %c0_11, %c0_12] : memref<4x2x32xf32, #tpu.memory_space<vmem>>, vector<1x2x32xf32>
    %13 = vector.shape_cast %12 : vector<1x2x32xf32> to vector<2x32xf32>
    %14 = vector.extract_strided_slice %13 {offsets = [0, 0], sizes = [1, 32], strides = [1, 1]} : vector<2x32xf32> to vector<1x32xf32>
    %15 = vector.extract_strided_slice %13 {offsets = [1, 0], sizes = [1, 32], strides = [1, 1]} : vector<2x32xf32> to vector<1x32xf32>
    %16 = vector.shape_cast %6 : vector<2x8x32xf32> to vector<16x32xf32>
    %17 = vector.extract_strided_slice %9 {offsets = [0, 0], sizes = [32, 32], strides = [1, 1]} : vector<32x128xf32> to vector<32x32xf32>
    %cst_13 = arith.constant dense<0.000000e+00> : vector<16x32xf32>
    %18 = tpu.matmul %16, %17, %cst_13 {dimension_numbers = #tpu.dot_dimension_numbers<[1], [0], [0], [1], [0, 0, 1, 1], [], []>} : vector<16x32xf32>, vector<32x32xf32>, vector<16x32xf32> -> vector<16x32xf32>
    %19 = vector.extract_strided_slice %11 {offsets = [0, 0], sizes = [1, 32], strides = [1, 1]} : vector<1x128xf32> to vector<1x32xf32>
    %20 = vector.broadcast %19 : vector<1x32xf32> to vector<16x32xf32>
    %21 = arith.addf %18, %20 : vector<16x32xf32>
    %22 = vector.shape_cast %21 : vector<16x32xf32> to vector<2x8x32xf32>
    %23 = vector.shape_cast %5 : vector<2x64x32xf32> to vector<128x32xf32>
    %24 = vector.extract_strided_slice %9 {offsets = [0, 32], sizes = [32, 64], strides = [1, 1]} : vector<32x128xf32> to vector<32x64xf32>
    %cst_14 = arith.constant dense<0.000000e+00> : vector<128x64xf32>
    %25 = tpu.matmul %23, %24, %cst_14 {dimension_numbers = #tpu.dot_dimension_numbers<[1], [0], [0], [1], [0, 0, 1, 1], [], []>} : vector<128x32xf32>, vector<32x64xf32>, vector<128x64xf32> -> vector<128x64xf32>
    %26 = vector.extract_strided_slice %11 {offsets = [0, 32], sizes = [1, 64], strides = [1, 1]} : vector<1x128xf32> to vector<1x64xf32>
    %27 = vector.broadcast %26 : vector<1x64xf32> to vector<128x64xf32>
    %28 = arith.addf %25, %27 : vector<128x64xf32>
    %29 = vector.shape_cast %28 : vector<128x64xf32> to vector<2x64x64xf32>
    %30 = vector.extract_strided_slice %29 {offsets = [0, 0, 0], sizes = [2, 64, 32], strides = [1, 1, 1]} : vector<2x64x64xf32> to vector<2x64x32xf32>
    %31 = vector.extract_strided_slice %29 {offsets = [0, 0, 32], sizes = [2, 64, 32], strides = [1, 1, 1]} : vector<2x64x64xf32> to vector<2x64x32xf32>
    "tpu.trace_start"() <{level = 10 : i32, message = "bqc,bkc->bqk"}> : () -> ()
    %cst_15 = arith.constant dense<0.000000e+00> : vector<2x8x64xf32>
    %32 = tpu.matmul %22, %30, %cst_15 {dimension_numbers = #tpu.dot_dimension_numbers<[2], [2], [1], [1], [0, 0, 0, 1, 1, 1], [0], [0]>} : vector<2x8x32xf32>, vector<2x64x32xf32>, vector<2x8x64xf32> -> vector<2x8x64xf32>
    "tpu.trace_stop"() : () -> ()
    %cst_16 = arith.constant 0.176776692 : f32
    %33 = vector.broadcast %cst_16 : f32 to vector<2x8x64xf32>
    %34 = arith.mulf %32, %33 : vector<2x8x64xf32>
    %cst_17 = arith.constant dense<0xFF800000> : vector<2x8xf32>
    %35 = vector.multi_reduction <maximumf>, %34, %cst_17 [2] : vector<2x8x64xf32> to vector<2x8xf32>
    %36 = vector.shape_cast %35 : vector<2x8xf32> to vector<2x8x1xf32>
    %37 = vector.broadcast %36 : vector<2x8x1xf32> to vector<2x8x64xf32>
    %38 = arith.subf %34, %37 : vector<2x8x64xf32>
    %39 = math.exp %38 : vector<2x8x64xf32>
    %cst_18 = arith.constant dense<0.000000e+00> : vector<2x8xf32>
    %40 = vector.multi_reduction <add>, %39, %cst_18 [2] : vector<2x8x64xf32> to vector<2x8xf32>
    %41 = vector.shape_cast %40 : vector<2x8xf32> to vector<2x8x1xf32>
    %42 = tpu.reciprocal %41 {approx = true} : vector<2x8x1xf32> -> vector<2x8x1xf32>
    %43 = vector.broadcast %42 : vector<2x8x1xf32> to vector<2x8x64xf32>
    %44 = arith.mulf %39, %43 : vector<2x8x64xf32>
    "tpu.trace_start"() <{level = 10 : i32, message = "bqk,bkc->bqc"}> : () -> ()
    %cst_19 = arith.constant dense<0.000000e+00> : vector<2x8x32xf32>
    %45 = tpu.matmul %44, %31, %cst_19 {dimension_numbers = #tpu.dot_dimension_numbers<[2], [1], [1], [2], [0, 0, 0, 1, 1, 2], [0], [0]>} : vector<2x8x64xf32>, vector<2x64x32xf32>, vector<2x8x32xf32> -> vector<2x8x32xf32>
    "tpu.trace_stop"() : () -> ()
    %46 = vector.shape_cast %45 : vector<2x8x32xf32> to vector<16x32xf32>
    %47 = vector.extract_strided_slice %9 {offsets = [0, 96], sizes = [32, 32], strides = [1, 1]} : vector<32x128xf32> to vector<32x32xf32>
    %cst_20 = arith.constant dense<0.000000e+00> : vector<16x32xf32>
    %48 = tpu.matmul %46, %47, %cst_20 {dimension_numbers = #tpu.dot_dimension_numbers<[1], [0], [0], [1], [0, 0, 1, 1], [], []>} : vector<16x32xf32>, vector<32x32xf32>, vector<16x32xf32> -> vector<16x32xf32>
    %49 = vector.extract_strided_slice %11 {offsets = [0, 96], sizes = [1, 32], strides = [1, 1]} : vector<1x128xf32> to vector<1x32xf32>
    %50 = vector.broadcast %49 : vector<1x32xf32> to vector<16x32xf32>
    %51 = arith.addf %48, %50 : vector<16x32xf32>
    %52 = vector.shape_cast %51 : vector<16x32xf32> to vector<2x8x32xf32>
    %53 = arith.addf %6, %52 : vector<2x8x32xf32>
    %cst_21 = arith.constant dense<0.000000e+00> : vector<2x8xf32>
    %54 = vector.multi_reduction <add>, %53, %cst_21 [2] : vector<2x8x32xf32> to vector<2x8xf32>
    %55 = vector.shape_cast %54 : vector<2x8xf32> to vector<2x8x1xf32>
    %cst_22 = arith.constant 3.200000e+01 : f32
    %56 = vector.broadcast %cst_22 : f32 to vector<2x8x1xf32>
    %57 = arith.divf %55, %56 : vector<2x8x1xf32>
    %58 = vector.broadcast %57 : vector<2x8x1xf32> to vector<2x8x32xf32>
    %59 = arith.subf %53, %58 : vector<2x8x32xf32>
    %60 = arith.mulf %59, %59 : vector<2x8x32xf32>
    %cst_23 = arith.constant dense<0.000000e+00> : vector<2x8xf32>
    %61 = vector.multi_reduction <add>, %60, %cst_23 [2] : vector<2x8x32xf32> to vector<2x8xf32>
    %62 = vector.shape_cast %61 : vector<2x8xf32> to vector<2x8x1xf32>
    %cst_24 = arith.constant 3.200000e+01 : f32
    %63 = vector.broadcast %cst_24 : f32 to vector<2x8x1xf32>
    %64 = arith.divf %62, %63 : vector<2x8x1xf32>
    %65 = vector.broadcast %57 : vector<2x8x1xf32> to vector<2x8x32xf32>
    %66 = arith.subf %53, %65 : vector<2x8x32xf32>
    %cst_25 = arith.constant 9.99999974E-6 : f32
    %67 = vector.broadcast %cst_25 : f32 to vector<2x8x1xf32>
    %68 = arith.addf %64, %67 : vector<2x8x1xf32>
    %69 = math.rsqrt %68 : vector<2x8x1xf32>
    %70 = vector.broadcast %69 : vector<2x8x1xf32> to vector<2x8x32xf32>
    %71 = arith.mulf %66, %70 : vector<2x8x32xf32>
    %72 = vector.shape_cast %14 : vector<1x32xf32> to vector<1x1x32xf32>
    %73 = vector.broadcast %72 : vector<1x1x32xf32> to vector<2x8x32xf32>
    %74 = arith.mulf %71, %73 : vector<2x8x32xf32>
    %75 = vector.shape_cast %15 : vector<1x32xf32> to vector<1x1x32xf32>
    %76 = vector.broadcast %75 : vector<1x1x32xf32> to vector<2x8x32xf32>
    %77 = arith.addf %74, %76 : vector<2x8x32xf32>
    %78 = vector.shape_cast %77 : vector<2x8x32xf32> to vector<16x32xf32>
    %c0_26 = arith.constant 0 : index
    %c0_27 = arith.constant 0 : index
    %79 = vector.load %arg7[%c0_26, %c0_27] : memref<32x32xf32, #tpu.memory_space<vmem>>, vector<32x32xf32>
    %cst_28 = arith.constant dense<0.000000e+00> : vector<16x32xf32>
    %80 = tpu.matmul %78, %79, %cst_28 {dimension_numbers = #tpu.dot_dimension_numbers<[1], [0], [0], [1], [0, 0, 1, 1], [], []>} : vector<16x32xf32>, vector<32x32xf32>, vector<16x32xf32> -> vector<16x32xf32>
    %c0_29 = arith.constant 0 : index
    %c0_30 = arith.constant 0 : index
    %81 = vector.load %arg8[%c0_29, %c0_30] : memref<1x32xf32, #tpu.memory_space<vmem>>, vector<1x32xf32>
    %82 = vector.broadcast %81 : vector<1x32xf32> to vector<16x32xf32>
    %83 = arith.addf %80, %82 : vector<16x32xf32>
    %84 = vector.shape_cast %83 : vector<16x32xf32> to vector<2x8x32xf32>
    %c0_31 = arith.constant 0 : index
    %c0_32 = arith.constant 0 : index
    %c0_33 = arith.constant 0 : index
    %85 = vector.load %arg13[%c0_31, %c0_32, %c0_33] : memref<2x8x32xf32, #tpu.memory_space<vmem>>, vector<2x8x32xf32>
    tpu.vector_store %arg13[%c0_31, %c0_32, %c0_33], %84 {strides = array<i32>} : memref<2x8x32xf32, #tpu.memory_space<vmem>>, vector<2x8x32xf32>,
    %86 = vector.extract_strided_slice %84 {offsets = [0, 0, 0], sizes = [2, 8, 16], strides = [1, 1, 1]} : vector<2x8x32xf32> to vector<2x8x16xf32>
    %87 = vector.extract_strided_slice %84 {offsets = [0, 0, 16], sizes = [2, 8, 16], strides = [1, 1, 1]} : vector<2x8x32xf32> to vector<2x8x16xf32>
    %c0_34 = arith.constant 0 : index
    %c0_35 = arith.constant 0 : index
    %c0_36 = arith.constant 0 : index
    %88 = vector.load %arg2[%c0_34, %c0_35, %c0_36] : memref<2x8x16xf32, #tpu.memory_space<vmem>>, vector<2x8x16xf32>
    %cst_37 = arith.constant 5.000000e-01 : f32
    %89 = vector.broadcast %cst_37 : f32 to vector<2x8x16xf32>
    %90 = arith.mulf %89, %87 : vector<2x8x16xf32>
    %91 = math.exp %90 : vector<2x8x16xf32>
    %92 = arith.mulf %88, %91 : vector<2x8x16xf32>
    %93 = arith.addf %92, %86 : vector<2x8x16xf32>
    %94 = vector.shape_cast %93 : vector<2x8x16xf32> to vector<16x16xf32>
    %c0_38 = arith.constant 0 : index
    %c0_39 = arith.constant 0 : index
    %95 = vector.load %arg9[%c0_38, %c0_39] : memref<16x32xf32, #tpu.memory_space<vmem>>, vector<16x32xf32>
    %cst_40 = arith.constant dense<0.000000e+00> : vector<16x32xf32>
    %96 = tpu.matmul %94, %95, %cst_40 {dimension_numbers = #tpu.dot_dimension_numbers<[1], [0], [0], [1], [0, 0, 1, 1], [], []>} : vector<16x16xf32>, vector<16x32xf32>, vector<16x32xf32> -> vector<16x32xf32>
    %c0_41 = arith.constant 0 : index
    %c0_42 = arith.constant 0 : index
    %97 = vector.load %arg10[%c0_41, %c0_42] : memref<1x32xf32, #tpu.memory_space<vmem>>, vector<1x32xf32>
    %98 = vector.broadcast %97 : vector<1x32xf32> to vector<16x32xf32>
    %99 = arith.addf %96, %98 : vector<16x32xf32>
    %100 = vector.shape_cast %99 : vector<16x32xf32> to vector<2x8x32xf32>
    %c1 = arith.constant 1 : index
    %c0_43 = arith.constant 0 : index
    %c0_44 = arith.constant 0 : index
    %101 = vector.load %arg4[%c1, %c0_43, %c0_44] : memref<4x32x128xf32, #tpu.memory_space<vmem>>, vector<1x32x128xf32>
    %102 = vector.shape_cast %101 : vector<1x32x128xf32> to vector<32x128xf32>
    %c1_45 = arith.constant 1 : index
    %c0_46 = arith.constant 0 : index
    %c0_47 = arith.constant 0 : index
    %103 = vector.load %arg5[%c1_45, %c0_46, %c0_47] : memref<4x1x128xf32, #tpu.memory_space<vmem>>, vector<1x1x128xf32>
    %104 = vector.shape_cast %103 : vector<1x1x128xf32> to vector<1x128xf32>
    %c1_48 = arith.constant 1 : index
    %c0_49 = arith.constant 0 : index
    %c0_50 = arith.constant 0 : index
    %105 = vector.load %arg6[%c1_48, %c0_49, %c0_50] : memref<4x2x32xf32, #tpu.memory_space<vmem>>, vector<1x2x32xf32>
    %106 = vector.shape_cast %105 : vector<1x2x32xf32> to vector<2x32xf32>
    %107 = vector.extract_strided_slice %106 {offsets = [0, 0], sizes = [1, 32], strides = [1, 1]} : vector<2x32xf32> to vector<1x32xf32>
    %108 = vector.extract_strided_slice %106 {offsets = [1, 0], sizes = [1, 32], strides = [1, 1]} : vector<2x32xf32> to vector<1x32xf32>
    %109 = vector.shape_cast %100 : vector<2x8x32xf32> to vector<16x32xf32>
    %110 = vector.extract_strided_slice %102 {offsets = [0, 0], sizes = [32, 96], strides = [1, 1]} : vector<32x128xf32> to vector<32x96xf32>
    %cst_51 = arith.constant dense<0.000000e+00> : vector<16x96xf32>
    %111 = tpu.matmul %109, %110, %cst_51 {dimension_numbers = #tpu.dot_dimension_numbers<[1], [0], [0], [1], [0, 0, 1, 1], [], []>} : vector<16x32xf32>, vector<32x96xf32>, vector<16x96xf32> -> vector<16x96xf32>
    %112 = vector.extract_strided_slice %104 {offsets = [0, 0], sizes = [1, 96], strides = [1, 1]} : vector<1x128xf32> to vector<1x96xf32>
    %113 = vector.broadcast %112 : vector<1x96xf32> to vector<16x96xf32>
    %114 = arith.addf %111, %113 : vector<16x96xf32>
    %115 = vector.shape_cast %114 : vector<16x96xf32> to vector<2x8x96xf32>
    %116 = vector.extract_strided_slice %115 {offsets = [0, 0, 0], sizes = [2, 8, 32], strides = [1, 1, 1]} : vector<2x8x96xf32> to vector<2x8x32xf32>
    %117 = vector.extract_strided_slice %115 {offsets = [0, 0, 32], sizes = [2, 8, 32], strides = [1, 1, 1]} : vector<2x8x96xf32> to vector<2x8x32xf32>
    %118 = vector.extract_strided_slice %115 {offsets = [0, 0, 64], sizes = [2, 8, 32], strides = [1, 1, 1]} : vector<2x8x96xf32> to vector<2x8x32xf32>
    "tpu.trace_start"() <{level = 10 : i32, message = "bqc,bkc->bqk"}> : () -> ()
    %cst_52 = arith.constant dense<0.000000e+00> : vector<2x8x8xf32>
    %119 = tpu.matmul %116, %117, %cst_52 {dimension_numbers = #tpu.dot_dimension_numbers<[2], [2], [1], [1], [0, 0, 0, 1, 1, 1], [0], [0]>} : vector<2x8x32xf32>, vector<2x8x32xf32>, vector<2x8x8xf32> -> vector<2x8x8xf32>
    "tpu.trace_stop"() : () -> ()
    %cst_53 = arith.constant 0.176776692 : f32
    %120 = vector.broadcast %cst_53 : f32 to vector<2x8x8xf32>
    %121 = arith.mulf %119, %120 : vector<2x8x8xf32>
    %cst_54 = arith.constant dense<0xFF800000> : vector<2x8xf32>
    %122 = vector.multi_reduction <maximumf>, %121, %cst_54 [2] : vector<2x8x8xf32> to vector<2x8xf32>
    %123 = vector.shape_cast %122 : vector<2x8xf32> to vector<2x8x1xf32>
    %124 = vector.broadcast %123 : vector<2x8x1xf32> to vector<2x8x8xf32>
    %125 = arith.subf %121, %124 : vector<2x8x8xf32>
    %126 = math.exp %125 : vector<2x8x8xf32>
    %cst_55 = arith.constant dense<0.000000e+00> : vector<2x8xf32>
    %127 = vector.multi_reduction <add>, %126, %cst_55 [2] : vector<2x8x8xf32> to vector<2x8xf32>
    %128 = vector.shape_cast %127 : vector<2x8xf32> to vector<2x8x1xf32>
    %129 = tpu.reciprocal %128 {approx = true} : vector<2x8x1xf32> -> vector<2x8x1xf32>
    %130 = vector.broadcast %129 : vector<2x8x1xf32> to vector<2x8x8xf32>
    %131 = arith.mulf %126, %130 : vector<2x8x8xf32>
    "tpu.trace_start"() <{level = 10 : i32, message = "bqk,bkc->bqc"}> : () -> ()
    %cst_56 = arith.constant dense<0.000000e+00> : vector<2x8x32xf32>
    %132 = tpu.matmul %131, %118, %cst_56 {dimension_numbers = #tpu.dot_dimension_numbers<[2], [1], [1], [2], [0, 0, 0, 1, 1, 2], [0], [0]>} : vector<2x8x8xf32>, vector<2x8x32xf32>, vector<2x8x32xf32> -> vector<2x8x32xf32>
    "tpu.trace_stop"() : () -> ()
    %133 = vector.shape_cast %132 : vector<2x8x32xf32> to vector<16x32xf32>
    %134 = vector.extract_strided_slice %102 {offsets = [0, 96], sizes = [32, 32], strides = [1, 1]} : vector<32x128xf32> to vector<32x32xf32>
    %cst_57 = arith.constant dense<0.000000e+00> : vector<16x32xf32>
    %135 = tpu.matmul %133, %134, %cst_57 {dimension_numbers = #tpu.dot_dimension_numbers<[1], [0], [0], [1], [0, 0, 1, 1], [], []>} : vector<16x32xf32>, vector<32x32xf32>, vector<16x32xf32> -> vector<16x32xf32>
    %136 = vector.extract_strided_slice %104 {offsets = [0, 96], sizes = [1, 32], strides = [1, 1]} : vector<1x128xf32> to vector<1x32xf32>
    %137 = vector.broadcast %136 : vector<1x32xf32> to vector<16x32xf32>
    %138 = arith.addf %135, %137 : vector<16x32xf32>
    %139 = vector.shape_cast %138 : vector<16x32xf32> to vector<2x8x32xf32>
    %140 = arith.addf %100, %139 : vector<2x8x32xf32>
    %cst_58 = arith.constant dense<0.000000e+00> : vector<2x8xf32>
    %141 = vector.multi_reduction <add>, %140, %cst_58 [2] : vector<2x8x32xf32> to vector<2x8xf32>
    %142 = vector.shape_cast %141 : vector<2x8xf32> to vector<2x8x1xf32>
    %cst_59 = arith.constant 3.200000e+01 : f32
    %143 = vector.broadcast %cst_59 : f32 to vector<2x8x1xf32>
    %144 = arith.divf %142, %143 : vector<2x8x1xf32>
    %145 = vector.broadcast %144 : vector<2x8x1xf32> to vector<2x8x32xf32>
    %146 = arith.subf %140, %145 : vector<2x8x32xf32>
    %147 = arith.mulf %146, %146 : vector<2x8x32xf32>
    %cst_60 = arith.constant dense<0.000000e+00> : vector<2x8xf32>
    %148 = vector.multi_reduction <add>, %147, %cst_60 [2] : vector<2x8x32xf32> to vector<2x8xf32>
    %149 = vector.shape_cast %148 : vector<2x8xf32> to vector<2x8x1xf32>
    %cst_61 = arith.constant 3.200000e+01 : f32
    %150 = vector.broadcast %cst_61 : f32 to vector<2x8x1xf32>
    %151 = arith.divf %149, %150 : vector<2x8x1xf32>
    %152 = vector.broadcast %144 : vector<2x8x1xf32> to vector<2x8x32xf32>
    %153 = arith.subf %140, %152 : vector<2x8x32xf32>
    %cst_62 = arith.constant 9.99999974E-6 : f32
    %154 = vector.broadcast %cst_62 : f32 to vector<2x8x1xf32>
    %155 = arith.addf %151, %154 : vector<2x8x1xf32>
    %156 = math.rsqrt %155 : vector<2x8x1xf32>
    %157 = vector.broadcast %156 : vector<2x8x1xf32> to vector<2x8x32xf32>
    %158 = arith.mulf %153, %157 : vector<2x8x32xf32>
    %159 = vector.shape_cast %107 : vector<1x32xf32> to vector<1x1x32xf32>
    %160 = vector.broadcast %159 : vector<1x1x32xf32> to vector<2x8x32xf32>
    %161 = arith.mulf %158, %160 : vector<2x8x32xf32>
    %162 = vector.shape_cast %108 : vector<1x32xf32> to vector<1x1x32xf32>
    %163 = vector.broadcast %162 : vector<1x1x32xf32> to vector<2x8x32xf32>
    %164 = arith.addf %161, %163 : vector<2x8x32xf32>
    %c2 = arith.constant 2 : index
    %c0_63 = arith.constant 0 : index
    %c0_64 = arith.constant 0 : index
    %165 = vector.load %arg4[%c2, %c0_63, %c0_64] : memref<4x32x128xf32, #tpu.memory_space<vmem>>, vector<1x32x128xf32>
    %166 = vector.shape_cast %165 : vector<1x32x128xf32> to vector<32x128xf32>
    %c2_65 = arith.constant 2 : index
    %c0_66 = arith.constant 0 : index
    %c0_67 = arith.constant 0 : index
    %167 = vector.load %arg5[%c2_65, %c0_66, %c0_67] : memref<4x1x128xf32, #tpu.memory_space<vmem>>, vector<1x1x128xf32>
    %168 = vector.shape_cast %167 : vector<1x1x128xf32> to vector<1x128xf32>
    %c2_68 = arith.constant 2 : index
    %c0_69 = arith.constant 0 : index
    %c0_70 = arith.constant 0 : index
    %169 = vector.load %arg6[%c2_68, %c0_69, %c0_70] : memref<4x2x32xf32, #tpu.memory_space<vmem>>, vector<1x2x32xf32>
    %170 = vector.shape_cast %169 : vector<1x2x32xf32> to vector<2x32xf32>
    %171 = vector.extract_strided_slice %170 {offsets = [0, 0], sizes = [1, 32], strides = [1, 1]} : vector<2x32xf32> to vector<1x32xf32>
    %172 = vector.extract_strided_slice %170 {offsets = [1, 0], sizes = [1, 32], strides = [1, 1]} : vector<2x32xf32> to vector<1x32xf32>
    %173 = vector.shape_cast %164 : vector<2x8x32xf32> to vector<16x32xf32>
    %174 = vector.extract_strided_slice %166 {offsets = [0, 0], sizes = [32, 96], strides = [1, 1]} : vector<32x128xf32> to vector<32x96xf32>
    %cst_71 = arith.constant dense<0.000000e+00> : vector<16x96xf32>
    %175 = tpu.matmul %173, %174, %cst_71 {dimension_numbers = #tpu.dot_dimension_numbers<[1], [0], [0], [1], [0, 0, 1, 1], [], []>} : vector<16x32xf32>, vector<32x96xf32>, vector<16x96xf32> -> vector<16x96xf32>
    %176 = vector.extract_strided_slice %168 {offsets = [0, 0], sizes = [1, 96], strides = [1, 1]} : vector<1x128xf32> to vector<1x96xf32>
    %177 = vector.broadcast %176 : vector<1x96xf32> to vector<16x96xf32>
    %178 = arith.addf %175, %177 : vector<16x96xf32>
    %179 = vector.shape_cast %178 : vector<16x96xf32> to vector<2x8x96xf32>
    %180 = vector.extract_strided_slice %179 {offsets = [0, 0, 0], sizes = [2, 8, 32], strides = [1, 1, 1]} : vector<2x8x96xf32> to vector<2x8x32xf32>
    %181 = vector.extract_strided_slice %179 {offsets = [0, 0, 32], sizes = [2, 8, 32], strides = [1, 1, 1]} : vector<2x8x96xf32> to vector<2x8x32xf32>
    %182 = vector.extract_strided_slice %179 {offsets = [0, 0, 64], sizes = [2, 8, 32], strides = [1, 1, 1]} : vector<2x8x96xf32> to vector<2x8x32xf32>
    "tpu.trace_start"() <{level = 10 : i32, message = "bqc,bkc->bqk"}> : () -> ()
    %cst_72 = arith.constant dense<0.000000e+00> : vector<2x8x8xf32>
    %183 = tpu.matmul %180, %181, %cst_72 {dimension_numbers = #tpu.dot_dimension_numbers<[2], [2], [1], [1], [0, 0, 0, 1, 1, 1], [0], [0]>} : vector<2x8x32xf32>, vector<2x8x32xf32>, vector<2x8x8xf32> -> vector<2x8x8xf32>
    "tpu.trace_stop"() : () -> ()
    %cst_73 = arith.constant 0.176776692 : f32
    %184 = vector.broadcast %cst_73 : f32 to vector<2x8x8xf32>
    %185 = arith.mulf %183, %184 : vector<2x8x8xf32>
    %cst_74 = arith.constant dense<0xFF800000> : vector<2x8xf32>
    %186 = vector.multi_reduction <maximumf>, %185, %cst_74 [2] : vector<2x8x8xf32> to vector<2x8xf32>
    %187 = vector.shape_cast %186 : vector<2x8xf32> to vector<2x8x1xf32>
    %188 = vector.broadcast %187 : vector<2x8x1xf32> to vector<2x8x8xf32>
    %189 = arith.subf %185, %188 : vector<2x8x8xf32>
    %190 = math.exp %189 : vector<2x8x8xf32>
    %cst_75 = arith.constant dense<0.000000e+00> : vector<2x8xf32>
    %191 = vector.multi_reduction <add>, %190, %cst_75 [2] : vector<2x8x8xf32> to vector<2x8xf32>
    %192 = vector.shape_cast %191 : vector<2x8xf32> to vector<2x8x1xf32>
    %193 = tpu.reciprocal %192 {approx = true} : vector<2x8x1xf32> -> vector<2x8x1xf32>
    %194 = vector.broadcast %193 : vector<2x8x1xf32> to vector<2x8x8xf32>
    %195 = arith.mulf %190, %194 : vector<2x8x8xf32>
    "tpu.trace_start"() <{level = 10 : i32, message = "bqk,bkc->bqc"}> : () -> ()
    %cst_76 = arith.constant dense<0.000000e+00> : vector<2x8x32xf32>
    %196 = tpu.matmul %195, %182, %cst_76 {dimension_numbers = #tpu.dot_dimension_numbers<[2], [1], [1], [2], [0, 0, 0, 1, 1, 2], [0], [0]>} : vector<2x8x8xf32>, vector<2x8x32xf32>, vector<2x8x32xf32> -> vector<2x8x32xf32>
    "tpu.trace_stop"() : () -> ()
    %197 = vector.shape_cast %196 : vector<2x8x32xf32> to vector<16x32xf32>
    %198 = vector.extract_strided_slice %166 {offsets = [0, 96], sizes = [32, 32], strides = [1, 1]} : vector<32x128xf32> to vector<32x32xf32>
    %cst_77 = arith.constant dense<0.000000e+00> : vector<16x32xf32>
    %199 = tpu.matmul %197, %198, %cst_77 {dimension_numbers = #tpu.dot_dimension_numbers<[1], [0], [0], [1], [0, 0, 1, 1], [], []>} : vector<16x32xf32>, vector<32x32xf32>, vector<16x32xf32> -> vector<16x32xf32>
    %200 = vector.extract_strided_slice %168 {offsets = [0, 96], sizes = [1, 32], strides = [1, 1]} : vector<1x128xf32> to vector<1x32xf32>
    %201 = vector.broadcast %200 : vector<1x32xf32> to vector<16x32xf32>
    %202 = arith.addf %199, %201 : vector<16x32xf32>
    %203 = vector.shape_cast %202 : vector<16x32xf32> to vector<2x8x32xf32>
    %204 = arith.addf %164, %203 : vector<2x8x32xf32>
    %cst_78 = arith.constant dense<0.000000e+00> : vector<2x8xf32>
    %205 = vector.multi_reduction <add>, %204, %cst_78 [2] : vector<2x8x32xf32> to vector<2x8xf32>
    %206 = vector.shape_cast %205 : vector<2x8xf32> to vector<2x8x1xf32>
    %cst_79 = arith.constant 3.200000e+01 : f32
    %207 = vector.broadcast %cst_79 : f32 to vector<2x8x1xf32>
    %208 = arith.divf %206, %207 : vector<2x8x1xf32>
    %209 = vector.broadcast %208 : vector<2x8x1xf32> to vector<2x8x32xf32>
    %210 = arith.subf %204, %209 : vector<2x8x32xf32>
    %211 = arith.mulf %210, %210 : vector<2x8x32xf32>
    %cst_80 = arith.constant dense<0.000000e+00> : vector<2x8xf32>
    %212 = vector.multi_reduction <add>, %211, %cst_80 [2] : vector<2x8x32xf32> to vector<2x8xf32>
    %213 = vector.shape_cast %212 : vector<2x8xf32> to vector<2x8x1xf32>
    %cst_81 = arith.constant 3.200000e+01 : f32
    %214 = vector.broadcast %cst_81 : f32 to vector<2x8x1xf32>
    %215 = arith.divf %213, %214 : vector<2x8x1xf32>
    %216 = vector.broadcast %208 : vector<2x8x1xf32> to vector<2x8x32xf32>
    %217 = arith.subf %204, %216 : vector<2x8x32xf32>
    %cst_82 = arith.constant 9.99999974E-6 : f32
    %218 = vector.broadcast %cst_82 : f32 to vector<2x8x1xf32>
    %219 = arith.addf %215, %218 : vector<2x8x1xf32>
    %220 = math.rsqrt %219 : vector<2x8x1xf32>
    %221 = vector.broadcast %220 : vector<2x8x1xf32> to vector<2x8x32xf32>
    %222 = arith.mulf %217, %221 : vector<2x8x32xf32>
    %223 = vector.shape_cast %171 : vector<1x32xf32> to vector<1x1x32xf32>
    %224 = vector.broadcast %223 : vector<1x1x32xf32> to vector<2x8x32xf32>
    %225 = arith.mulf %222, %224 : vector<2x8x32xf32>
    %226 = vector.shape_cast %172 : vector<1x32xf32> to vector<1x1x32xf32>
    %227 = vector.broadcast %226 : vector<1x1x32xf32> to vector<2x8x32xf32>
    %228 = arith.addf %225, %227 : vector<2x8x32xf32>
    %c3 = arith.constant 3 : index
    %c0_83 = arith.constant 0 : index
    %c0_84 = arith.constant 0 : index
    %229 = vector.load %arg4[%c3, %c0_83, %c0_84] : memref<4x32x128xf32, #tpu.memory_space<vmem>>, vector<1x32x128xf32>
    %230 = vector.shape_cast %229 : vector<1x32x128xf32> to vector<32x128xf32>
    %c3_85 = arith.constant 3 : index
    %c0_86 = arith.constant 0 : index
    %c0_87 = arith.constant 0 : index
    %231 = vector.load %arg5[%c3_85, %c0_86, %c0_87] : memref<4x1x128xf32, #tpu.memory_space<vmem>>, vector<1x1x128xf32>
    %232 = vector.shape_cast %231 : vector<1x1x128xf32> to vector<1x128xf32>
    %c3_88 = arith.constant 3 : index
    %c0_89 = arith.constant 0 : index
    %c0_90 = arith.constant 0 : index
    %233 = vector.load %arg6[%c3_88, %c0_89, %c0_90] : memref<4x2x32xf32, #tpu.memory_space<vmem>>, vector<1x2x32xf32>
    %234 = vector.shape_cast %233 : vector<1x2x32xf32> to vector<2x32xf32>
    %235 = vector.extract_strided_slice %234 {offsets = [0, 0], sizes = [1, 32], strides = [1, 1]} : vector<2x32xf32> to vector<1x32xf32>
    %236 = vector.extract_strided_slice %234 {offsets = [1, 0], sizes = [1, 32], strides = [1, 1]} : vector<2x32xf32> to vector<1x32xf32>
    %237 = vector.shape_cast %7 : vector<2x16x32xf32> to vector<32x32xf32>
    %238 = vector.extract_strided_slice %230 {offsets = [0, 0], sizes = [32, 32], strides = [1, 1]} : vector<32x128xf32> to vector<32x32xf32>
    %cst_91 = arith.constant dense<0.000000e+00> : vector<32x32xf32>
    %239 = tpu.matmul %237, %238, %cst_91 {dimension_numbers = #tpu.dot_dimension_numbers<[1], [0], [0], [1], [0, 0, 1, 1], [], []>} : vector<32x32xf32>, vector<32x32xf32>, vector<32x32xf32> -> vector<32x32xf32>
    %240 = vector.extract_strided_slice %232 {offsets = [0, 0], sizes = [1, 32], strides = [1, 1]} : vector<1x128xf32> to vector<1x32xf32>
    %241 = vector.broadcast %240 : vector<1x32xf32> to vector<32x32xf32>
    %242 = arith.addf %239, %241 : vector<32x32xf32>
    %243 = vector.shape_cast %242 : vector<32x32xf32> to vector<2x16x32xf32>
    %244 = vector.shape_cast %228 : vector<2x8x32xf32> to vector<16x32xf32>
    %245 = vector.extract_strided_slice %230 {offsets = [0, 32], sizes = [32, 64], strides = [1, 1]} : vector<32x128xf32> to vector<32x64xf32>
    %cst_92 = arith.constant dense<0.000000e+00> : vector<16x64xf32>
    %246 = tpu.matmul %244, %245, %cst_92 {dimension_numbers = #tpu.dot_dimension_numbers<[1], [0], [0], [1], [0, 0, 1, 1], [], []>} : vector<16x32xf32>, vector<32x64xf32>, vector<16x64xf32> -> vector<16x64xf32>
    %247 = vector.extract_strided_slice %232 {offsets = [0, 32], sizes = [1, 64], strides = [1, 1]} : vector<1x128xf32> to vector<1x64xf32>
    %248 = vector.broadcast %247 : vector<1x64xf32> to vector<16x64xf32>
    %249 = arith.addf %246, %248 : vector<16x64xf32>
    %250 = vector.shape_cast %249 : vector<16x64xf32> to vector<2x8x64xf32>
    %251 = vector.extract_strided_slice %250 {offsets = [0, 0, 0], sizes = [2, 8, 32], strides = [1, 1, 1]} : vector<2x8x64xf32> to vector<2x8x32xf32>
    %252 = vector.extract_strided_slice %250 {offsets = [0, 0, 32], sizes = [2, 8, 32], strides = [1, 1, 1]} : vector<2x8x64xf32> to vector<2x8x32xf32>
    "tpu.trace_start"() <{level = 10 : i32, message = "bqc,bkc->bqk"}> : () -> ()
    %cst_93 = arith.constant dense<0.000000e+00> : vector<2x16x8xf32>
    %253 = tpu.matmul %243, %251, %cst_93 {dimension_numbers = #tpu.dot_dimension_numbers<[2], [2], [1], [1], [0, 0, 0, 1, 1, 1], [0], [0]>} : vector<2x16x32xf32>, vector<2x8x32xf32>, vector<2x16x8xf32> -> vector<2x16x8xf32>
    "tpu.trace_stop"() : () -> ()
    %cst_94 = arith.constant 0.176776692 : f32
    %254 = vector.broadcast %cst_94 : f32 to vector<2x16x8xf32>
    %255 = arith.mulf %253, %254 : vector<2x16x8xf32>
    %cst_95 = arith.constant dense<0xFF800000> : vector<2x16xf32>
    %256 = vector.multi_reduction <maximumf>, %255, %cst_95 [2] : vector<2x16x8xf32> to vector<2x16xf32>
    %257 = vector.shape_cast %256 : vector<2x16xf32> to vector<2x16x1xf32>
    %258 = vector.broadcast %257 : vector<2x16x1xf32> to vector<2x16x8xf32>
    %259 = arith.subf %255, %258 : vector<2x16x8xf32>
    %260 = math.exp %259 : vector<2x16x8xf32>
    %cst_96 = arith.constant dense<0.000000e+00> : vector<2x16xf32>
    %261 = vector.multi_reduction <add>, %260, %cst_96 [2] : vector<2x16x8xf32> to vector<2x16xf32>
    %262 = vector.shape_cast %261 : vector<2x16xf32> to vector<2x16x1xf32>
    %263 = tpu.reciprocal %262 {approx = true} : vector<2x16x1xf32> -> vector<2x16x1xf32>
    %264 = vector.broadcast %263 : vector<2x16x1xf32> to vector<2x16x8xf32>
    %265 = arith.mulf %260, %264 : vector<2x16x8xf32>
    "tpu.trace_start"() <{level = 10 : i32, message = "bqk,bkc->bqc"}> : () -> ()
    %cst_97 = arith.constant dense<0.000000e+00> : vector<2x16x32xf32>
    %266 = tpu.matmul %265, %252, %cst_97 {dimension_numbers = #tpu.dot_dimension_numbers<[2], [1], [1], [2], [0, 0, 0, 1, 1, 2], [0], [0]>} : vector<2x16x8xf32>, vector<2x8x32xf32>, vector<2x16x32xf32> -> vector<2x16x32xf32>
    "tpu.trace_stop"() : () -> ()
    %267 = vector.shape_cast %266 : vector<2x16x32xf32> to vector<32x32xf32>
    %268 = vector.extract_strided_slice %230 {offsets = [0, 96], sizes = [32, 32], strides = [1, 1]} : vector<32x128xf32> to vector<32x32xf32>
    %cst_98 = arith.constant dense<0.000000e+00> : vector<32x32xf32>
    %269 = tpu.matmul %267, %268, %cst_98 {dimension_numbers = #tpu.dot_dimension_numbers<[1], [0], [0], [1], [0, 0, 1, 1], [], []>} : vector<32x32xf32>, vector<32x32xf32>, vector<32x32xf32> -> vector<32x32xf32>
    %270 = vector.extract_strided_slice %232 {offsets = [0, 96], sizes = [1, 32], strides = [1, 1]} : vector<1x128xf32> to vector<1x32xf32>
    %271 = vector.broadcast %270 : vector<1x32xf32> to vector<32x32xf32>
    %272 = arith.addf %269, %271 : vector<32x32xf32>
    %273 = vector.shape_cast %272 : vector<32x32xf32> to vector<2x16x32xf32>
    %274 = arith.addf %7, %273 : vector<2x16x32xf32>
    %cst_99 = arith.constant dense<0.000000e+00> : vector<2x16xf32>
    %275 = vector.multi_reduction <add>, %274, %cst_99 [2] : vector<2x16x32xf32> to vector<2x16xf32>
    %276 = vector.shape_cast %275 : vector<2x16xf32> to vector<2x16x1xf32>
    %cst_100 = arith.constant 3.200000e+01 : f32
    %277 = vector.broadcast %cst_100 : f32 to vector<2x16x1xf32>
    %278 = arith.divf %276, %277 : vector<2x16x1xf32>
    %279 = vector.broadcast %278 : vector<2x16x1xf32> to vector<2x16x32xf32>
    %280 = arith.subf %274, %279 : vector<2x16x32xf32>
    %281 = arith.mulf %280, %280 : vector<2x16x32xf32>
    %cst_101 = arith.constant dense<0.000000e+00> : vector<2x16xf32>
    %282 = vector.multi_reduction <add>, %281, %cst_101 [2] : vector<2x16x32xf32> to vector<2x16xf32>
    %283 = vector.shape_cast %282 : vector<2x16xf32> to vector<2x16x1xf32>
    %cst_102 = arith.constant 3.200000e+01 : f32
    %284 = vector.broadcast %cst_102 : f32 to vector<2x16x1xf32>
    %285 = arith.divf %283, %284 : vector<2x16x1xf32>
    %286 = vector.broadcast %278 : vector<2x16x1xf32> to vector<2x16x32xf32>
    %287 = arith.subf %274, %286 : vector<2x16x32xf32>
    %cst_103 = arith.constant 9.99999974E-6 : f32
    %288 = vector.broadcast %cst_103 : f32 to vector<2x16x1xf32>
    %289 = arith.addf %285, %288 : vector<2x16x1xf32>
    %290 = math.rsqrt %289 : vector<2x16x1xf32>
    %291 = vector.broadcast %290 : vector<2x16x1xf32> to vector<2x16x32xf32>
    %292 = arith.mulf %287, %291 : vector<2x16x32xf32>
    %293 = vector.shape_cast %235 : vector<1x32xf32> to vector<1x1x32xf32>
    %294 = vector.broadcast %293 : vector<1x1x32xf32> to vector<2x16x32xf32>
    %295 = arith.mulf %292, %294 : vector<2x16x32xf32>
    %296 = vector.shape_cast %236 : vector<1x32xf32> to vector<1x1x32xf32>
    %297 = vector.broadcast %296 : vector<1x1x32xf32> to vector<2x16x32xf32>
    %298 = arith.addf %295, %297 : vector<2x16x32xf32>
    %c0_104 = arith.constant 0 : index
    %c0_105 = arith.constant 0 : index
    %299 = vector.load %arg11[%c0_104, %c0_105] : memref<1x32xf32, #tpu.memory_space<vmem>>, vector<1x32xf32>
    %300 = vector.shape_cast %299 : vector<1x32xf32> to vector<1x1x32xf32>
    %301 = vector.broadcast %300 : vector<1x1x32xf32> to vector<2x1x32xf32>
    "tpu.trace_start"() <{level = 10 : i32, message = "boc,bmc->bom"}> : () -> ()
    %cst_106 = arith.constant dense<0.000000e+00> : vector<2x1x16xf32>
    %302 = tpu.matmul %301, %298, %cst_106 {dimension_numbers = #tpu.dot_dimension_numbers<[2], [2], [1], [1], [0, 0, 0, 1, 1, 1], [0], [0]>} : vector<2x1x32xf32>, vector<2x16x32xf32>, vector<2x1x16xf32> -> vector<2x1x16xf32>
    "tpu.trace_stop"() : () -> ()
    %c0_107 = arith.constant 0 : index
    %c0_108 = arith.constant 0 : index
    %303 = vector.load %arg12[%c0_107, %c0_108] : memref<1x1xf32, #tpu.memory_space<vmem>>, vector<1x1xf32>
    %304 = vector.shape_cast %303 : vector<1x1xf32> to vector<1x1x1xf32>
    %305 = vector.broadcast %304 : vector<1x1x1xf32> to vector<2x1x16xf32>
    %306 = arith.addf %302, %305 : vector<2x1x16xf32>
    %307 = math.tanh %306 : vector<2x1x16xf32>
    %cst_109 = arith.constant 5.000000e-01 : f32
    %308 = vector.broadcast %cst_109 : f32 to vector<2x1x16xf32>
    %309 = arith.mulf %308, %307 : vector<2x1x16xf32>
    %cst_110 = arith.constant 5.000000e-01 : f32
    %310 = vector.broadcast %cst_110 : f32 to vector<2x1x16xf32>
    %311 = arith.addf %309, %310 : vector<2x1x16xf32>
    %c0_111 = arith.constant 0 : index
    %c0_112 = arith.constant 0 : index
    %c0_113 = arith.constant 0 : index
    %312 = vector.load %arg14[%c0_111, %c0_112, %c0_113] : memref<2x1x16xf32, #tpu.memory_space<vmem>>, vector<2x1x16xf32>
    tpu.vector_store %arg14[%c0_111, %c0_112, %c0_113], %311 {strides = array<i32>} : memref<2x1x16xf32, #tpu.memory_space<vmem>>, vector<2x1x16xf32>,
    return
  }
  func.func @transform_0(%arg0: i32) -> (i32, i32, i32) {
    %c0_i32 = arith.constant 0 : i32
    %c0_i32_0 = arith.constant 0 : i32
    %c0_i32_1 = arith.constant 0 : i32
    return %arg0, %c0_i32, %c0_i32_0 : i32, i32, i32
  }
  func.func @transform_1(%arg0: i32) -> (i32, i32, i32) {
    %c0_i32 = arith.constant 0 : i32
    %c0_i32_0 = arith.constant 0 : i32
    %c0_i32_1 = arith.constant 0 : i32
    return %arg0, %c0_i32, %c0_i32_0 : i32, i32, i32
  }
  func.func @transform_2(%arg0: i32) -> (i32, i32) {
    %c0_i32 = arith.constant 0 : i32
    %c0_i32_0 = arith.constant 0 : i32
    %c0_i32_1 = arith.constant 0 : i32
    return %c0_i32, %c0_i32_0 : i32, i32
  }
  func.func @transform_3(%arg0: i32) -> (i32, i32, i32) {
    %c0_i32 = arith.constant 0 : i32
    %c0_i32_0 = arith.constant 0 : i32
    %c0_i32_1 = arith.constant 0 : i32
    %c0_i32_2 = arith.constant 0 : i32
    return %c0_i32, %c0_i32_0, %c0_i32_1 : i32, i32, i32
  }
  func.func @transform_4(%arg0: i32) -> (i32, i32, i32) {
    %c0_i32 = arith.constant 0 : i32
    %c0_i32_0 = arith.constant 0 : i32
    %c0_i32_1 = arith.constant 0 : i32
    %c0_i32_2 = arith.constant 0 : i32
    return %c0_i32, %c0_i32_0, %c0_i32_1 : i32, i32, i32
  }
  func.func @transform_5(%arg0: i32) -> (i32, i32, i32) {
    %c0_i32 = arith.constant 0 : i32
    %c0_i32_0 = arith.constant 0 : i32
    %c0_i32_1 = arith.constant 0 : i32
    %c0_i32_2 = arith.constant 0 : i32
    return %c0_i32, %c0_i32_0, %c0_i32_1 : i32, i32, i32
  }
  func.func @transform_6(%arg0: i32) -> (i32, i32) {
    %c0_i32 = arith.constant 0 : i32
    %c0_i32_0 = arith.constant 0 : i32
    %c0_i32_1 = arith.constant 0 : i32
    return %c0_i32, %c0_i32_0 : i32, i32
  }
  func.func @transform_7(%arg0: i32) -> (i32, i32) {
    %c0_i32 = arith.constant 0 : i32
    %c0_i32_0 = arith.constant 0 : i32
    %c0_i32_1 = arith.constant 0 : i32
    return %c0_i32, %c0_i32_0 : i32, i32
  }
  func.func @transform_8(%arg0: i32) -> (i32, i32) {
    %c0_i32 = arith.constant 0 : i32
    %c0_i32_0 = arith.constant 0 : i32
    %c0_i32_1 = arith.constant 0 : i32
    return %c0_i32, %c0_i32_0 : i32, i32
  }
  func.func @transform_9(%arg0: i32) -> (i32, i32) {
    %c0_i32 = arith.constant 0 : i32
    %c0_i32_0 = arith.constant 0 : i32
    %c0_i32_1 = arith.constant 0 : i32
    return %c0_i32, %c0_i32_0 : i32, i32
  }
  func.func @transform_10(%arg0: i32) -> (i32, i32) {
    %c0_i32 = arith.constant 0 : i32
    %c0_i32_0 = arith.constant 0 : i32
    %c0_i32_1 = arith.constant 0 : i32
    return %c0_i32, %c0_i32_0 : i32, i32
  }
  func.func @transform_11(%arg0: i32) -> (i32, i32) {
    %c0_i32 = arith.constant 0 : i32
    %c0_i32_0 = arith.constant 0 : i32
    %c0_i32_1 = arith.constant 0 : i32
    return %c0_i32, %c0_i32_0 : i32, i32
  }
  func.func @transform_12(%arg0: i32) -> (i32, i32, i32) {
    %c0_i32 = arith.constant 0 : i32
    %c0_i32_0 = arith.constant 0 : i32
    %c0_i32_1 = arith.constant 0 : i32
    return %arg0, %c0_i32, %c0_i32_0 : i32, i32, i32
  }
  func.func @transform_13(%arg0: i32) -> (i32, i32, i32) {
    %c0_i32 = arith.constant 0 : i32
    %c0_i32_0 = arith.constant 0 : i32
    %c0_i32_1 = arith.constant 0 : i32
    return %arg0, %c0_i32, %c0_i32_0 : i32, i32, i32
  }
}

</mosaic_0001>

<bundles_post_ra>
// kernel: custom-call.4
= control target key start
LH: loop header
LB: loop body
LE: loop exit
PB: predicated region body
PF: predicated region fallthrough
CT: control target
= control target key end

     0   :  { %s6_s0 = inlined_call_operand.vmem [shape: f32[2,64], index: 0, kind: output, shape index: {}]  }

// kernel: shape_autoencoder_forward.1
= control target key start
LH: loop header
LB: loop body
LE: loop exit
PB: predicated region body
PF: predicated region fallthrough
CT: control target
= control target key end

     0   :  { %s5231_s0 = inlined_call_operand.vmem [shape: f32[2,88,3], index: 0, kind: input, shape index: {}]   ;;  %s5232_s1 = inlined_call_operand.vmem [shape: f32[2,8,16], index: 1, kind: input, shape index: {}]   ;;  %s5233_s2 = inlined_call_operand.vmem [shape: f32[3,32], index: 2, kind: input, shape index: {}]   ;;  %s5234_s3 = inlined_call_operand.vmem [shape: f32[4,32,128], index: 3, kind: input, shape index: {}]   ;;  %s5235_s4 = inlined_call_operand.vmem [shape: f32[4,1,128], index: 4, kind: input, shape index: {}]   ;;  %s5236_s5 = inlined_call_operand.vmem [shape: f32[4,2,32], index: 5, kind: input, shape index: {}]   ;;  %s5237_s6 = inlined_call_operand.vmem [shape: f32[32,32], index: 6, kind: input, shape index: {}]   ;;  %s5238_s7 = inlined_call_operand.vmem [shape: f32[1,32], index: 7, kind: input, shape index: {}]   ;;  %s5239_s8 = inlined_call_operand.vmem [shape: f32[16,32], index: 8, kind: input, shape index: {}]   ;;  %s5240_s9 = inlined_call_operand.vmem [shape: f32[1,32], index: 9, kind: input, shape index: {}]   ;;  %s5241_s10 = inlined_call_operand.vmem [shape: f32[1,32], index: 10, kind: input, shape index: {}]   ;;  %s5242_s11 = inlined_call_operand.<no memory space> [shape: f32[1,1], index: 11, kind: input, shape index: {}]   ;;  %s5243_s12 = inlined_call_operand.vmem [shape: f32[2,8,32], index: 12, kind: output, shape index: {0}]   ;;  %s5244_s13 = inlined_call_operand.hbm [shape: f32[2,1,16], index: 13, kind: output, shape index: {1}]  }
   0x1   :  { %v19_v0 = vstv %s5242_s11 }
   0x2   :  { %20 = vst [vmem:[#allocation2] sm:$0x1] %v19_v0 }
   0x3   :  { %v68_v1 = vld [vmem:[%s5233_s2] sm:$0x7]  ;;  %vm136_vm0 = vcmask 1042432   ;;  %vm69_vm1 = vcmask 23552   ;;  %v47_v3 = vld [vmem:[%s5231_s0 + $0x8] sm:$0xff]  ;;  %v48_v4 = vld [vmem:[%s5231_s0 + $0x10] sm:$0xff] }
   0x4   :  { %v46_v2 = vld [vmem:[%s5231_s0] sm:$0xff]  ;;  %3802 = vmatprep.subr.msk.mxu0 %vm136_vm0, %v68_v1  ;;  %v49_v5 = vld [vmem:[%s5231_s0 + $0x18] sm:$0xff]  ;;  %v316_v8 = vld [vmem:[%s5234_s3 + $0x8] sm:$0xff] }
   0x5   :  { %3804 = vmatprep.mubr.msk.f32.mxu0 %vm69_vm1, %v46_v2  ;;  %3803 = vmatpush3.msk.msra.mxu0 %vm136_vm0, %v68_v1  ;;  %v50_v6 = vld [vmem:[%s5231_s0 + $0x20] sm:$0xff]  ;;  %v317_v9 = vld [vmem:[%s5234_s3 + $0x10] sm:$0xff]  ;;  %v51_v10 = vld [vmem:[%s5231_s0 + $0x28] sm:$0xff] }
   0x6   :  { %3805 = vmatmul.mubr.msk.f32.vlgmr.msra.gmra.mrb[0].mxu0 %vm69_vm1, %v47_v3  ;;  %v315_v7 = vld [vmem:[%s5234_s3] sm:$0xff]  ;;  %v318_v12 = vld [vmem:[%s5234_s3 + $0x18] sm:$0xff] }
   0x7   :  { %3807 = vmatprep.mubr.msk.f32.mxu0 %vm69_vm1, %v48_v4  ;;  %v4622_v11 = vpack.i.bf16 %v316_v8, %v315_v7 }
   0xa   :  { %3808 = vmatmul.mubr.msk.f32.gmra.mrb[2].mxu0 %vm69_vm1, %v49_v5 }
   0xb   :  { %3810 = vmatprep.mubr.msk.f32.mxu0 %vm69_vm1, %v50_v6 }
   0xc   :  { %21 = vsyncpa [#allocation4], 0  ;;  %v52_v13 = vld [vmem:[%s5231_s0 + $0x30] sm:$0xff]  ;;  %s4503_s15 = smov 96   ;;  %v4632_v14 = vpack.i.bf16 %v318_v12, %v317_v9  ;;  %v53_v15 = vld [vmem:[%s5231_s0 + $0x38] sm:$0xff]  ;;  %v4142_v28 = vpack.c.bf16 %v316_v8, %v315_v7  ;;  %v4146_v29 = vpack.c.bf16 %v318_v12, %v317_v9  ;;  %vm327_vm2 = vcmask 261120  }
   0xd   :  { %4310 = vrot.lane.b32.xlu0 %v4622_v11, %s4503_s15  ;;  %v54_v16 = vld [vmem:[%s5231_s0 + $0x40] sm:$0xff]  ;;  %v55_v17 = vld [vmem:[%s5231_s0 + $0x48] sm:$0xff]  ;;  %v56_v18 = vld [vmem:[%s5231_s0 + $0x50] sm:$0xff]  ;;  %v4504_v59 = vmov 0.0|0.0   ;;  %vm4505_vm3 = vmmov 0   ;;  %v4506_v62 = vmov 0.0  }
   0xe   :  { %3811 = vmatmul.mubr.msk.f32.gmra.mrb[4].mxu0 %vm69_vm1, %v51_v10  ;;  %v57_v19 = vld [vmem:[%s5231_s0 + $0x58] sm:$0xff]  ;;  %v58_v20 = vld [vmem:[%s5231_s0 + $0x60] sm:$0xff]  ;;  %v59_v21 = vld [vmem:[%s5231_s0 + $0x68] sm:$0xff]  ;;  %4143 = vmatprep.subr.bf16.mxu1 %v4142_v28  ;;  %vm817_vm5 = vcmask 523264   ;;  %vm1294_vm6 = vcmask 130048   ;;  %vm1628_vm7 = vcmask 64512  }
   0xf   :  { %3813 = vmatprep.mubr.msk.f32.mxu0 %vm69_vm1, %v52_v13  ;;  %v60_v22 = vld [vmem:[%s5231_s0 + $0x70] sm:$0xff]  ;;  %v61_v23 = vld [vmem:[%s5231_s0 + $0x78] sm:$0xff]  ;;  %v62_v24 = vld [vmem:[%s5231_s0 + $0x80] sm:$0xff]  ;;  %4145 = vmatpush3.bf16.msra.mxu1 %v4142_v28  ;;  %vm3461_vm8 = vcmask 122880  }
  0x10   :  { %v63_v25 = vld [vmem:[%s5231_s0 + $0x88] sm:$0xff]  ;;  %v64_v26 = vld [vmem:[%s5231_s0 + $0x90] sm:$0xff]  ;;  %v65_v27 = vld [vmem:[%s5231_s0 + $0x98] sm:$0xff]  ;;  %4147 = vmatprep.subr.bf16.mxu1 %v4146_v29  ;;  %4158 = vmatprep.subr.bf16.mxu0 %v4504_v59 }
  0x11   :  { %4315 = vrot.lane.b32.xlu0 %v4632_v14, %s4503_s15  ;;  %v4693_v34 = vld [vmem:[%s5235_s4] ss:$0 sm:$0xff]  ;;  %v67_v61 = vld [vmem:[%s5231_s0 + $0xa8] sm:$0xff]  ;;  %vm4749_vm4 = vmpackc.low %vm327_vm2, %vm327_vm2 }
  0x12   :  { %3814 = vmatmul.mubr.msk.f32.gmra.mrb[6].mxu0 %vm69_vm1, %v53_v15  ;;  %425 = vrot.lane.b32.xlu1 %v4693_v34, %s4503_s15  ;;  %v66_v60 = vld [vmem:[%s5231_s0 + $0xa0] sm:$0xff]  ;;  %s4507_s0 = smov 32  }
  0x13   :  { %3816 = vmatprep.mubr.msk.f32.mxu0 %vm69_vm1, %v54_v16  ;;  %4149 = vmatpush3.bf16.msra.mxu1 %v4146_v29 }
  0x16   :  { %3817 = vmatmul.mubr.msk.f32.gmra.mrb[8].mxu0 %vm69_vm1, %v55_v17 }
  0x17   :  { %3819 = vmatprep.mubr.msk.f32.mxu0 %vm69_vm1, %v56_v18 }
  0x1a   :  { %3820 = vmatmul.mubr.msk.f32.gmra.mrb[10].mxu0 %vm69_vm1, %v57_v19 }
  0x1b   :  { %3822 = vmatprep.mubr.msk.f32.mxu0 %vm69_vm1, %v58_v20 }
  0x1e   :  { %3823 = vmatmul.mubr.msk.f32.gmra.mrb[12].mxu0 %vm69_vm1, %v59_v21 }
  0x1f   :  { %3825 = vmatprep.mubr.msk.f32.mxu0 %vm69_vm1, %v60_v22 }
  0x22   :  { %3826 = vmatmul.mubr.msk.f32.gmra.mrb[14].mxu0 %vm69_vm1, %v61_v23 }
  0x23   :  { %3828 = vmatprep.mubr.msk.f32.mxu0 %vm69_vm1, %v62_v24 }
  0x26   :  { %3829 = vmatmul.mubr.msk.f32.gmra.mrb[16].mxu0 %vm69_vm1, %v63_v25 }
  0x27   :  { %3831 = vmatprep.mubr.msk.f32.mxu0 %vm69_vm1, %v64_v26 }
  0x2a   :  { %3832 = vmatmul.mubr.msk.f32.gmra.mrb[18].mxu0 %vm69_vm1, %v65_v27 }
  0x2b   :  { %3834 = vmatprep.mubr.msk.f32.mxu0 %vm69_vm1, %v66_v60 }
  0x2e   :  { %3835 = vmatmul.mubr.msk.f32.gmra.mrb[20].mxu0 %vm69_vm1, %v67_v61 }
  0x2f   :  { %3896 = vmatprep.mubr.msk.f32.mxu0 %vm4505_vm3, %v4506_v62 }
  0x7f   :  { %v4311_v30 = vpop.permute.xlu0 %4310 }
  0x80   :  { %v4313_v31 = vunpack.i.h.bf16 %v4311_v30  ;;  %v4312_v32 = vunpack.i.l.bf16 %v4311_v30 }
  0x82   :  { %v4150_v33 = vpack.c.bf16 %v4313_v31, %v4312_v32 }
  0x83   :  { %v4316_v50 = vpop.permute.xlu0 %4315 }
  0x84   :  { %4151 = vmatprep.subr.bf16.mxu1 %v4150_v33  ;;  %v4318_v52 = vunpack.i.h.bf16 %v4316_v50  ;;  %v4317_v53 = vunpack.i.l.bf16 %v4316_v50  ;;  %v426_v1 = vpop.permute.xlu1 %425 }
  0x86   :  { %v4154_v56 = vpack.c.bf16 %v4318_v52, %v4317_v53 }
  0xd9   :  { %v3806_v35 = vpop.f32.mrb[0].mxu0 }
  0xda   :  { %v206_v36 = vpop.f32.mrb[1].mxu0 }
  0xdd   :  { %v3809_v37 = vpop.f32.mrb[2].mxu0 }
  0xde   :  { %v216_v38 = vpop.f32.mrb[3].mxu0 }
  0xe1   :  { %v3812_v39 = vpop.f32.mrb[4].mxu0 }
  0xe2   :  { %v226_v40 = vpop.f32.mrb[5].mxu0 }
  0xe5   :  { %v3815_v41 = vpop.f32.mrb[6].mxu0 }
  0xe6   :  { %v236_v42 = vpop.f32.mrb[7].mxu0 }
  0xe9   :  { %v4697_v43 = vpop.f32.mrb[8].mxu0 }
  0xea   :  { %v4699_v44 = vpop.f32.mrb[9].mxu0 }
  0xeb   :  { %3845 = vmatprep.mubr.msk.f32.mxu1 %vm327_vm2, %v4699_v44 }
  0xed   :  { %v3821_v45 = vpop.f32.mrb[10].mxu0 }
  0xee   :  { %v4703_v46 = vpop.f32.mrb[11].mxu0 }
  0xf1   :  { %v3824_v47 = vpop.f32.mrb[12].mxu0 }
  0xf2   :  { %v266_v48 = vpop.f32.mrb[13].mxu0 }
  0xf5   :  { %v3827_v49 = vpop.f32.mrb[14].mxu0 }
  0xf6   :  { %v276_v51 = vpop.f32.mrb[15].mxu0 }
  0xf9   :  { %v3830_v54 = vpop.f32.mrb[16].mxu0 }
  0xfa   :  { %v286_v55 = vpop.f32.mrb[17].mxu0 }
  0xfd   :  { %v4705_v57 = vpop.f32.mrb[18].mxu0 }
  0xfe   :  { %v296_v58 = vpop.f32.mrb[19].mxu0  ;;  %3846 = vmatmul.mubr.msk.f32.vlgmr.msra.gmra.mrb[0].mxu1 %vm327_vm2, %v4705_v57 }
  0xff   :  { %4153 = vmatpush3.bf16.msra.mxu1 %v4150_v33  ;;  %3856 = vmatprep.mubr.msk.f32.mxu1 %vm327_vm2, %v206_v36 }
 0x100   :  { %4155 = vmatprep.subr.bf16.mxu1 %v4154_v56 }
 0x101   :  { %v4823_v61 = vpop.f32.mrb[20].mxu0 }
 0x103   :  { %4157 = vmatpush3.bf16.msra.mxu1 %v4154_v56 }
 0x104   :  { %4174 = vmatprep.subr.bf16.mxu1 %v4504_v59 }
 0x106   :  { %3857 = vmatmul.mubr.msk.f32.vlgmr.msra.gmra.mrb[2].mxu1 %vm327_vm2, %v3806_v35 }
 0x107   :  { %3859 = vmatprep.mubr.msk.f32.mxu1 %vm327_vm2, %v216_v38 }
 0x10a   :  { %3860 = vmatmul.mubr.msk.f32.gmra.mrb[4].mxu1 %vm327_vm2, %v3809_v37 }
 0x10b   :  { %3862 = vmatprep.mubr.msk.f32.mxu1 %vm327_vm2, %v226_v40 }
 0x10e   :  { %3863 = vmatmul.mubr.msk.f32.gmra.mrb[6].mxu1 %vm327_vm2, %v3812_v39 }
 0x10f   :  { %3865 = vmatprep.mubr.msk.f32.mxu1 %vm327_vm2, %v236_v42 }
 0x112   :  { %3866 = vmatmul.mubr.msk.f32.gmra.mrb[8].mxu1 %vm327_vm2, %v3815_v41 }
 0x113   :  { %3868 = vmatprep.mubr.msk.f32.mxu1 %vm327_vm2, %v3821_v45 }
 0x116   :  { %3869 = vmatmul.mubr.msk.f32.gmra.mrb[10].mxu1 %vm327_vm2, %v266_v48 }
 0x117   :  { %3871 = vmatprep.mubr.msk.f32.mxu1 %vm327_vm2, %v3824_v47 }
 0x11a   :  { %3872 = vmatmul.mubr.msk.f32.gmra.mrb[12].mxu1 %vm327_vm2, %v276_v51 }
 0x11b   :  { %3874 = vmatprep.mubr.msk.f32.mxu1 %vm327_vm2, %v3827_v49 }
 0x11e   :  { %3875 = vmatmul.mubr.msk.f32.gmra.mrb[14].mxu1 %vm327_vm2, %v286_v55 }
 0x11f   :  { %3877 = vmatprep.mubr.msk.f32.mxu1 %vm327_vm2, %v3830_v54 }
 0x122   :  { %3878 = vmatmul.mubr.msk.f32.gmra.mrb[16].mxu1 %vm327_vm2, %v296_v58 }
 0x123   :  { %3915 = vmatprep.mubr.msk.f32.mxu1 %vm4505_vm3, %v4506_v62 }
 0x1d1   :  { %v4739_v63 = vpop.f32.mrb[0].mxu1 }
 0x1d2   :  { %v4741_v0 = vpop.f32.mrb[1].mxu1  ;;  %v406_v60 = vadd.f32 %v4739_v63, %v4693_v34 }
 0x1d3   :  { %v401_v58 = vadd.f32 %v4693_v34, %v4741_v0  ;;  %v4825_v0 = vpop.f32.mrb[21].mxu0 }
 0x1d9   :  { %v3858_v2 = vpop.f32.mrb[2].mxu1 }
 0x1da   :  { %v4743_v3 = vadd.f32 %v3858_v2, %v426_v1  ;;  %v542_v4 = vpop.f32.mrb[3].mxu1 }
 0x1db   :  { %v4745_v5 = vadd.f32 %v542_v4, %v426_v1 }
 0x1dd   :  { %v4319_v7 = vpack.i.bf16 %v4743_v3, %v4745_v5  ;;  %v4159_v8 = vpack.c.bf16 %v4743_v3, %v4745_v5  ;;  %v3861_v9 = vpop.f32.mrb[4].mxu1 }
 0x1de   :  { %v4757_v10 = vadd.f32 %v3861_v9, %v426_v1  ;;  %v552_v12 = vpop.f32.mrb[5].mxu1 }
 0x1df   :  { %v4759_v13 = vadd.f32 %v552_v12, %v426_v1  ;;  %4161 = vmatpush3.bf16.xpose.msk.msra.mxu0 %vm4749_vm4, %v4159_v8 }
 0x1e0   :  { %4162 = vmatprep.subr.bf16.mxu0 %v4504_v59 }
 0x1e1   :  { %v4329_v15 = vpack.i.bf16 %v4757_v10, %v4759_v13  ;;  %v4163_v16 = vpack.c.bf16 %v4757_v10, %v4759_v13  ;;  %v3864_v17 = vpop.f32.mrb[6].mxu1 }
 0x1e2   :  { %v4768_v18 = vadd.f32 %v3864_v17, %v426_v1  ;;  %v562_v19 = vpop.f32.mrb[7].mxu1 }
 0x1e3   :  { %v4770_v20 = vadd.f32 %v562_v19, %v426_v1 }
 0x1e5   :  { %v4339_v21 = vpack.i.bf16 %v4768_v18, %v4770_v20  ;;  %v4167_v22 = vpack.c.bf16 %v4768_v18, %v4770_v20  ;;  %v3867_v23 = vpop.f32.mrb[8].mxu1 }
 0x1e6   :  { %v4776_v24 = vadd.f32 %v3867_v23, %v426_v1  ;;  %v572_v25 = vpop.f32.mrb[9].mxu1 }
 0x1e7   :  { %v4778_v26 = vadd.f32 %v572_v25, %v426_v1  ;;  %4165 = vmatpush3.bf16.xpose.msk.msra.mxu0 %vm4749_vm4, %v4163_v16 }
 0x1e8   :  { %4166 = vmatprep.subr.bf16.mxu0 %v4504_v59 }
 0x1e9   :  { %v4349_v27 = vpack.i.bf16 %v4776_v24, %v4778_v26  ;;  %v4171_v28 = vpack.c.bf16 %v4776_v24, %v4778_v26  ;;  %v3870_v29 = vpop.f32.mrb[10].mxu1 }
 0x1ea   :  { %v588_v30 = vadd.f32 %v3870_v29, %v426_v1  ;;  %v582_v31 = vpop.f32.mrb[11].mxu1 }
 0x1eb   :  { %v583_v32 = vadd.f32 %v582_v31, %v426_v1 }
 0x1ed   :  { %v4324_v33 = vpack.i.bf16 %v588_v30, %v583_v32  ;;  %v4175_v35 = vpack.c.bf16 %v588_v30, %v583_v32  ;;  %v3873_v36 = vpop.f32.mrb[12].mxu1 }
 0x1ee   :  { %v598_v37 = vadd.f32 %v3873_v36, %v426_v1  ;;  %v592_v38 = vpop.f32.mrb[13].mxu1 }
 0x1ef   :  { %v593_v39 = vadd.f32 %v592_v38, %v426_v1  ;;  %4169 = vmatpush3.bf16.xpose.msk.msra.mxu0 %vm4749_vm4, %v4167_v22  ;;  %4177 = vmatpush3.bf16.xpose.msk.msra.mxu1 %vm4749_vm4, %v4175_v35 }
 0x1f0   :  { %4170 = vmatprep.subr.bf16.mxu0 %v4504_v59  ;;  %4178 = vmatprep.subr.bf16.mxu1 %v4504_v59 }
 0x1f1   :  { %v4334_v40 = vpack.i.bf16 %v598_v37, %v593_v39  ;;  %v4179_v41 = vpack.c.bf16 %v598_v37, %v593_v39  ;;  %v3876_v42 = vpop.f32.mrb[14].mxu1 }
 0x1f2   :  { %v608_v45 = vadd.f32 %v3876_v42, %v426_v1  ;;  %v602_v47 = vpop.f32.mrb[15].mxu1 }
 0x1f3   :  { %v603_v48 = vadd.f32 %v602_v47, %v426_v1 }
 0x1f5   :  { %v4344_v49 = vpack.i.bf16 %v608_v45, %v603_v48  ;;  %v4183_v50 = vpack.c.bf16 %v608_v45, %v603_v48  ;;  %v3879_v51 = vpop.f32.mrb[16].mxu1 }
 0x1f6   :  { %v4793_v52 = vadd.f32 %v3879_v51, %v426_v1  ;;  %v612_v53 = vpop.f32.mrb[17].mxu1 }
 0x1f7   :  { %v4795_v54 = vadd.f32 %v612_v53, %v426_v1  ;;  %4173 = vmatpush3.bf16.xpose.msk.msra.mxu0 %vm4749_vm4, %v4171_v28  ;;  %4181 = vmatpush3.bf16.xpose.msk.msra.mxu1 %vm4749_vm4, %v4179_v41 }
 0x1f8   :  { %4182 = vmatprep.subr.bf16.mxu1 %v4504_v59  ;;  %4190 = vmatprep.subr.bf16.mxu0 %v4504_v59 }
 0x1f9   :  { %v4354_v55 = vpack.i.bf16 %v4793_v52, %v4795_v54  ;;  %v4187_v56 = vpack.c.bf16 %v4793_v52, %v4795_v54 }
 0x1fe   :  { %3897 = vmatmul.mubr.msk.f32.vlgmr.msra.gmra.mrb[22].mxu0 %vm327_vm2, %v401_v58 }
 0x1ff   :  { %4185 = vmatpush3.bf16.xpose.msk.msra.mxu1 %vm4749_vm4, %v4183_v50  ;;  %3934 = vmatprep.mubr.msk.f32.mxu0 %vm4505_vm3, %v4506_v62 }
 0x200   :  { %4186 = vmatprep.subr.bf16.mxu1 %v4504_v59 }
 0x207   :  { %4189 = vmatpush3.bf16.xpose.msk.msra.mxu1 %vm4749_vm4, %v4187_v56 }
 0x208   :  { %4202 = vmatprep.subr.bf16.mxu1 %v4504_v59 }
 0x20e   :  { %3916 = vmatmul.mubr.msk.f32.vlgmr.msra.gmra.mrb[18].mxu1 %vm327_vm2, %v406_v60 }
 0x20f   :  { %3953 = vmatprep.mubr.msk.f32.mxu1 %vm4505_vm3, %v4506_v62 }
 0x2d1   :  { %v714_v1 = vpop.f32.mrb[22].mxu0 }
 0x2d2   :  { %v815_v2 = vmul.f32 0.17677669, %v714_v1  ;;  %v3898_v4 = vpop.f32.mrb[23].mxu0 }
 0x2d4   :  { %v818_v8 = vsel %vm817_vm5, %v815_v2, -inf }
 0x2d5   :  { %819 = vmax.xlane.f32.xlu1 %v818_v8 }
 0x2e1   :  { %v811_v9 = vpop.f32.mrb[18].mxu1 }
 0x2e2   :  { %v816_v12 = vmul.f32 0.17677669, %v811_v9  ;;  %v3917_v16 = vpop.f32.mrb[19].mxu1 }
 0x2e4   :  { %v821_v63 = vsel %vm817_vm5, %v816_v12, -inf }
 0x2e5   :  { %822 = vmax.xlane.f32.xlu0 %v821_v63 }
 0x2e6   :  { %4325 = vrot.lane.b32.xlu1 %v4324_v33, %s4503_s15 }
 0x2ea   :  { %4330 = vrot.lane.b32.xlu1 %v4329_v15, %s4503_s15 }
 0x2ee   :  { %4340 = vrot.lane.b32.xlu1 %v4339_v21, %s4503_s15 }
 0x2fb   :  { %4320 = vrot.lane.b32.xlu0 %v4319_v7, %s4503_s15 }
 0x2ff   :  { %4335 = vrot.lane.b32.xlu0 %v4334_v40, %s4503_s15 }
 0x303   :  { %4345 = vrot.lane.b32.xlu0 %v4344_v49, %s4503_s15 }
 0x362   :  { %v820_v17 = vpop.xlane.xlu1 %819 }
 0x363   :  { %v824_v19 = vsub.f32 %v815_v2, %v820_v17 }
 0x365   :  { %v826_v22 = vmul.f32 1.442695, %v824_v19 }
 0x366   :  { %v4326_v23 = vpop.permute.xlu1 %4325 }
 0x367   :  { %4411 = vpow2.f32 %v826_v22  ;;  %v4328_v10 = vunpack.i.h.bf16 %v4326_v23  ;;  %v4327_v13 = vunpack.i.l.bf16 %v4326_v23 }
 0x369   :  { %v4203_v15 = vpack.c.bf16 %v4328_v10, %v4327_v13 }
 0x36a   :  { %v4331_v7 = vpop.permute.xlu1 %4330 }
 0x36b   :  { %4204 = vmatpush3.bf16.msra.mxu1 %v4203_v15  ;;  %v4333_v30 = vunpack.i.h.bf16 %v4331_v7  ;;  %v4332_v31 = vunpack.i.l.bf16 %v4331_v7 }
 0x36c   :  { %4205 = vmatprep.subr.bf16.mxu1 %v4504_v59 }
 0x36d   :  { %v4194_v38 = vpack.c.bf16 %v4333_v30, %v4332_v31 }
 0x36e   :  { %v4341_v33 = vpop.permute.xlu1 %4340 }
 0x36f   :  { %v4343_v39 = vunpack.i.h.bf16 %v4341_v33  ;;  %v4342_v40 = vunpack.i.l.bf16 %v4341_v33 }
 0x371   :  { %v4845_v18 = vpop.eup %4411  ;;  %v4197_v49 = vpack.c.bf16 %v4343_v39, %v4342_v40  ;;  %v1173_v40 = vld [vmem:[%s5237_s6 + $0x10] sm:$0xff] }
 0x372   :  { %v823_v20 = vpop.xlane.xlu0 %822  ;;  %v830_v3 = vsel %vm817_vm5, %v4845_v18, 0.0 }
 0x373   :  { %v825_v5 = vsub.f32 %v816_v12, %v823_v20  ;;  %831 = vadd.xlane.f32.xlu0 %v830_v3 }
 0x375   :  { %v828_v21 = vmul.f32 1.442695, %v825_v5 }
 0x376   :  { %v4321_v25 = vpop.permute.xlu0 %4320 }
 0x377   :  { %4413 = vpow2.f32 %v828_v21  ;;  %v4323_v28 = vunpack.i.h.bf16 %v4321_v25  ;;  %v4322_v29 = vunpack.i.l.bf16 %v4321_v25 }
 0x379   :  { %v4191_v32 = vpack.c.bf16 %v4323_v28, %v4322_v29 }
 0x37a   :  { %v4336_v35 = vpop.permute.xlu0 %4335 }
 0x37b   :  { %v4338_v36 = vunpack.i.h.bf16 %v4336_v35  ;;  %v4337_v37 = vunpack.i.l.bf16 %v4336_v35  ;;  %4192 = vmatpush3.bf16.msra.mxu0 %v4191_v32 }
 0x37c   :  { %4193 = vmatprep.subr.bf16.mxu0 %v4504_v59 }
 0x37d   :  { %v4206_v41 = vpack.c.bf16 %v4338_v36, %v4337_v37 }
 0x37e   :  { %v4346_v42 = vpop.permute.xlu0 %4345 }
 0x37f   :  { %v4348_v45 = vunpack.i.h.bf16 %v4346_v42  ;;  %v4347_v47 = vunpack.i.l.bf16 %v4346_v42  ;;  %4195 = vmatpush3.bf16.msra.mxu0 %v4194_v38  ;;  %4207 = vmatpush3.bf16.msra.mxu1 %v4206_v41  ;;  %v1172_v38 = vld [vmem:[%s5237_s6 + $0x8] sm:$0xff]  ;;  %v1174_v41 = vld [vmem:[%s5237_s6 + $0x18] sm:$0xff] }
 0x380   :  { %4196 = vmatprep.subr.bf16.mxu0 %v4504_v59  ;;  %4208 = vmatprep.subr.bf16.mxu1 %v4504_v59  ;;  %v4226_v42 = vpack.c.bf16 %v1174_v41, %v1173_v40  ;;  %v3560_v40 = vld [vmem:[%s5235_s4 + $0x1] ss:$0 sm:$0xff] }
 0x381   :  { %v4414_v48 = vpop.eup %4413  ;;  %v4209_v50 = vpack.c.bf16 %v4348_v45, %v4347_v47 }
 0x382   :  { %v833_v51 = vsel %vm817_vm5, %v4414_v48, 0.0 }
 0x383   :  { %834 = vadd.xlane.f32.xlu1 %v833_v51  ;;  %4198 = vmatpush3.bf16.msra.mxu0 %v4197_v49 }
 0x384   :  { %4210 = vmatpush3.bf16.msra.mxu1 %v4209_v50  ;;  %4199 = vmatprep.subr.bf16.mxu0 %v4504_v59 }
 0x385   :  { %4211 = vmatprep.subr.bf16.mxu1 %v4504_v59 }
 0x389   :  { %4355 = vrot.lane.b32.xlu0 %v4354_v55, %s4503_s15 }
 0x38d   :  { %4365 = vrot.lane.b32.xlu0 %v4632_v14, %s4507_s0 }
 0x394   :  { %4350 = vrot.lane.b32.xlu1 %v4349_v27, %s4503_s15 }
 0x398   :  { %4360 = vrot.lane.b32.xlu1 %v4622_v11, %s4507_s0 }
 0x39c   :  { %1046 = vrot.lane.b32.xlu1 %v4693_v34, %s4507_s0 }
 0x400   :  { %v832_v53 = vpop.xlane.xlu0 %831 }
 0x401   :  { %4415 = vrcp.f32 %v832_v53 }
 0x404   :  { %v4356_v56 = vpop.permute.xlu0 %4355 }
 0x405   :  { %v4358_v58 = vunpack.i.h.bf16 %v4356_v56  ;;  %v4357_v52 = vunpack.i.l.bf16 %v4356_v56 }
 0x407   :  { %v4212_v54 = vpack.c.bf16 %v4358_v58, %v4357_v52  ;;  %v320_v52 = vld [vmem:[%s5236_s5] sm:$0x3] }
 0x408   :  { %v4366_v26 = vpop.permute.xlu0 %4365 }
 0x409   :  { %4213 = vmatpush3.bf16.msra.mxu1 %v4212_v54  ;;  %v4368_v2 = vunpack.i.h.bf16 %v4366_v26  ;;  %v4367_v14 = vunpack.i.l.bf16 %v4366_v26 }
 0x40b   :  { %v4416_v11 = vpop.eup %4415  ;;  %v4218_v63 = vpack.c.bf16 %v4368_v2, %v4367_v14 }
 0x40c   :  { %v838_v9 = vmul.f32 %v4416_v11, %v4845_v18 }
 0x410   :  { %v835_v55 = vpop.xlane.xlu1 %834 }
 0x411   :  { %4417 = vrcp.f32 %v835_v55 }
 0x414   :  { %v4351_v24 = vpop.permute.xlu1 %4350 }
 0x415   :  { %v4353_v27 = vunpack.i.h.bf16 %v4351_v24  ;;  %v4352_v60 = vunpack.i.l.bf16 %v4351_v24 }
 0x417   :  { %v4200_v1 = vpack.c.bf16 %v4353_v27, %v4352_v60 }
 0x418   :  { %v4361_v4 = vpop.permute.xlu1 %4360 }
 0x419   :  { %4201 = vmatpush3.bf16.msra.mxu0 %v4200_v1  ;;  %v4363_v34 = vunpack.i.h.bf16 %v4361_v4  ;;  %v4362_v8 = vunpack.i.l.bf16 %v4361_v4 }
 0x41b   :  { %v4418_v12 = vpop.eup %4417  ;;  %v4214_v16 = vpack.c.bf16 %v4363_v34, %v4362_v8  ;;  %v3548_v34 = vld [vmem:[%s5238_s7] ss:$0 sm:$0xff] }
 0x41c   :  { %v839_v17 = vmul.f32 %v4418_v12, %v4414_v48  ;;  %3935 = vmatmul.mubr.msk.f32.vlgmr.msra.gmra.mrb[24].mxu0 %vm817_vm5, %v838_v9  ;;  %v1047_v13 = vpop.permute.xlu1 %1046  ;;  %v1159_v48 = vlaneseq }
 0x41d   :  { %4215 = vmatprep.subr.bf16.mxu0 %v4214_v16 }
 0x41e   :  { %3954 = vmatmul.mubr.msk.f32.vlgmr.msra.gmra.mrb[20].mxu1 %vm817_vm5, %v839_v17  ;;  %4217 = vmatpush3.bf16.msra.mxu0 %v4214_v16  ;;  %v1160_v53 = vshrl.u32 %v1159_v48, 7 }
 0x41f   :  { %4219 = vmatprep.subr.bf16.mxu0 %v4218_v63 }
 0x420   :  { %v4895_v58 = vsub.s32 0, %v1160_v53  ;;  %v4900_v54 = vsub.s32 1, %v1160_v53 }
 0x422   :  { %4221 = vmatpush3.bf16.msra.mxu0 %v4218_v63  ;;  %v1162_v55 = vrot.slane %v320_v52, %v4895_v58  ;;  %v1168_v27 = vrot.slane %v320_v52, %v4900_v54 }
 0x423   :  { %3996 = vmatprep.subr.mxu0 %v4506_v62 }
 0x4ef   :  { %v933_v19 = vpop.f32.mrb[24].mxu0 }
 0x4f0   :  { %v3936_v22 = vpop.f32.mrb[25].mxu0  ;;  %3964 = vmatprep.mubr.msk.f32.mxu0 %vm327_vm2, %v933_v19 }
 0x4f1   :  { %v1030_v23 = vpop.f32.mrb[20].mxu1  ;;  %v1285_v22 = vld [vmem:[%s5239_s8] sm:$0xff] }
 0x4f2   :  { %v3955_v10 = vpop.f32.mrb[21].mxu1  ;;  %3965 = vmatmul.mubr.msk.f32.vlgmr.msra.gmra.mrb[26].mxu0 %vm327_vm2, %v1030_v23  ;;  %v1286_v23 = vld [vmem:[%s5239_s8 + $0x8] sm:$0xff]  ;;  %s4508_s8 = smov 112  }
 0x4f3   :  { %3998 = vmatprep.mubr.msk.f32.mxu0 %vm4505_vm3, %v4506_v62 }
 0x5c5   :  { %v3966_v15 = vpop.f32.mrb[26].mxu0 }
 0x5c6   :  { %v1127_v18 = vadd.f32 %v3966_v15, %v1047_v13  ;;  %v1121_v20 = vpop.f32.mrb[27].mxu0  ;;  %v4926_v15 = vld [vmem:[%s5234_s3 + $0x20] sm:$0xff] }
 0x5c7   :  { %v1122_v3 = vadd.f32 %v1121_v20, %v1047_v13  ;;  %v4230_v13 = vpack.c.bf16 %v1286_v23, %v1285_v22 }
 0x5c8   :  { %v1131_v5 = vadd.f32 %v4705_v57, %v1127_v18  ;;  %v4931_v18 = vld [vmem:[%s5234_s3 + $0x28] sm:$0xff] }
 0x5c9   :  { %v1130_v7 = vadd.f32 %v1122_v3, %v4699_v44  ;;  %v1171_v44 = vld [vmem:[%s5237_s6] sm:$0xff]  ;;  %v4234_v20 = vpack.c.bf16 %v4931_v18, %v4926_v15 }
 0x5ca   :  { %v1135_v21 = vsel %vm327_vm2, %v1131_v5, 0.0  ;;  %v4222_v39 = vpack.c.bf16 %v1172_v38, %v1171_v44 }
 0x5cb   :  { %1136 = vadd.xlane.f32.xlu1 %v1135_v21  ;;  %v1132_v25 = vsel %vm327_vm2, %v1130_v7, 0.0  ;;  %v1265_v21 = vld [vmem:[%s5232_s1] sm:$0xff] }
 0x5cc   :  { %1133 = vadd.xlane.f32.xlu0 %v1132_v25  ;;  %4223 = vmatprep.subr.bf16.mxu1 %v4222_v39 }
 0x5cd   :  { %4225 = vmatpush3.bf16.msra.mxu1 %v4222_v39 }
 0x5ce   :  { %4227 = vmatprep.subr.bf16.mxu1 %v4226_v42 }
 0x5d1   :  { %4229 = vmatpush3.bf16.msra.mxu1 %v4226_v42 }
 0x5d2   :  { %4231 = vmatprep.subr.bf16.mxu1 %v4230_v13 }
 0x658   :  { %v1137_v28 = vpop.xlane.xlu1 %1136 }
 0x659   :  { %v1140_v29 = vmul.f32 0.03125, %v1137_v28  ;;  %v1134_v30 = vpop.xlane.xlu0 %1133 }
 0x65a   :  { %v1139_v31 = vmul.f32 0.03125, %v1134_v30 }
 0x65b   :  { %v1142_v32 = vsub.f32 %v1131_v5, %v1140_v29 }
 0x65c   :  { %v1141_v33 = vsub.f32 %v1130_v7, %v1139_v31  ;;  %v1266_v7 = vld [vmem:[%s5232_s1 + $0x8] sm:$0xff] }
 0x65d   :  { %v1144_v37 = vmul.f32 %v1142_v32, %v1142_v32 }
 0x65e   :  { %v1143_v35 = vmul.f32 %v1141_v33, %v1141_v33 }
 0x65f   :  { %v1148_v57 = vsel %vm327_vm2, %v1144_v37, 0.0  ;;  %v3551_v37 = vld [vmem:[%s5240_s9] ss:$0 sm:$0xff]  ;;  %s4509_s9 = smov 64  }
 0x660   :  { %v1145_v36 = vsel %vm327_vm2, %v1143_v35, 0.0  ;;  %v4949_v35 = vld [vmem:[%s5234_s3 + $0x38] sm:$0xff] }
 0x661   :  { %1146 = vadd.xlane.f32.xlu0 %v1145_v36 }
 0x665   :  { %1149 = vadd.xlane.f32.xlu0 %v1148_v57 }
 0x6ee   :  { %v1147_v45 = vpop.xlane.xlu0 %1146 }
 0x6ef   :  { %v1151_v47 = vmul.f32 0.03125, %v1147_v45 }
 0x6f1   :  { %v1153_v49 = vadd.f32 1e-05, %v1151_v47 }
 0x6f2   :  { %v1150_v50 = vpop.xlane.xlu0 %1149 }
 0x6f3   :  { %4419 = vrsqrt.f32 %v1153_v49  ;;  %v1152_v51 = vmul.f32 0.03125, %v1150_v50 }
 0x6f5   :  { %v1154_v56 = vadd.f32 1e-05, %v1152_v51 }
 0x6f7   :  { %4421 = vrsqrt.f32 %v1154_v56 }
 0x6fd   :  { %v4420_v24 = vpop.eup %4419 }
 0x6fe   :  { %v1157_v26 = vmul.f32 %v4420_v24, %v1141_v33  ;;  %v4944_v33 = vld [vmem:[%s5234_s3 + $0x30] sm:$0xff] }
 0x6ff   :  { %v4238_v36 = vpack.c.bf16 %v4949_v35, %v4944_v33 }
 0x700   :  { %v1163_v60 = vmul.f32 %v1162_v55, %v1157_v26 }
 0x701   :  { %v4422_v11 = vpop.eup %4421 }
 0x702   :  { %v1158_v1 = vmul.f32 %v4422_v11, %v1142_v32  ;;  %v1169_v2 = vadd.f32 %v1168_v27, %v1163_v60 }
 0x704   :  { %v1164_v14 = vmul.f32 %v1162_v55, %v1158_v1  ;;  %3975 = vmatprep.mubr.msk.f32.mxu1 %vm327_vm2, %v1169_v2 }
 0x706   :  { %v1170_v4 = vadd.f32 %v1168_v27, %v1164_v14 }
 0x708   :  { %3976 = vmatmul.mubr.msk.f32.vlgmr.msra.gmra.mrb[22].mxu1 %vm327_vm2, %v1170_v4 }
 0x709   :  { %4233 = vmatpush3.bf16.msra.mxu1 %v4230_v13 }
 0x70a   :  { %4235 = vmatprep.subr.bf16.mxu1 %v4234_v20 }
 0x7db   :  { %v3977_v8 = vpop.f32.mrb[22].mxu1 }
 0x7dc   :  { %v1260_v9 = vadd.f32 %v3977_v8, %v3548_v34  ;;  %v1254_v12 = vpop.f32.mrb[23].mxu1 }
 0x7dd   :  { %v1255_v16 = vadd.f32 %v3548_v34, %v1254_v12 }
 0x7de   :  { %1264 = vst.msk [vmem:[%s5243_s12 + $0x8] sm:$0xff] %vm327_vm2, %v1260_v9  ;;  %v1268_v63 = vmul.f32 0.5, %v1260_v9 }
 0x7df   :  { %1263 = vst.msk [vmem:[%s5243_s12] sm:$0xff] %vm327_vm2, %v1255_v16  ;;  %v1267_v17 = vmul.f32 0.5, %v1255_v16 }
 0x7e0   :  { %v1271_v19 = vmul.f32 1.442695, %v1268_v63  ;;  %v4374_v63 = vpack.i.bf16 %v4949_v35, %v4944_v33 }
 0x7e1   :  { %v1269_v10 = vmul.f32 1.442695, %v1267_v17 }
 0x7e2   :  { %4423 = vpow2.f32 %v1271_v19 }
 0x7e3   :  { %4425 = vpow2.f32 %v1269_v10 }
 0x7ec   :  { %v4424_v3 = vpop.eup %4423 }
 0x7ed   :  { %v4426_v5 = vpop.eup %4425  ;;  %1277 = vrot.lane.b32.xlu0 %v4424_v3, %s4508_s8 }
 0x7ee   :  { %1275 = vrot.lane.b32.xlu1 %v4426_v5, %s4508_s8 }
 0x85f   :  { %v1278_v25 = vpop.permute.xlu0 %1277 }
 0x860   :  { %v1282_v28 = vmul.f32 %v1278_v25, %v1266_v7  ;;  %v1276_v29 = vpop.permute.xlu1 %1275 }
 0x861   :  { %v1281_v30 = vmul.f32 %v1276_v29, %v1265_v21 }
 0x862   :  { %v1284_v32 = vadd.f32 %v1282_v28, %v1260_v9 }
 0x863   :  { %v1283_v31 = vadd.f32 %v1281_v30, %v1255_v16  ;;  %v4369_v16 = vpack.i.bf16 %v4931_v18, %v4926_v15 }
 0x865   :  { %3982 = vmatprep.mubr.msk.f32.mxu1 %vm1294_vm6, %v1283_v31 }
 0x866   :  { %3983 = vmatmul.mubr.msk.f32.vlgmr.msra.gmra.mrb[24].mxu1 %vm1294_vm6, %v1284_v32 }
 0x867   :  { %4237 = vmatpush3.bf16.msra.mxu1 %v4234_v20 }
 0x868   :  { %4239 = vmatprep.subr.bf16.mxu1 %v4238_v36 }
 0x86b   :  { %4241 = vmatpush3.bf16.msra.mxu1 %v4238_v36 }
 0x86c   :  { %4006 = vmatprep.subr.mxu1 %v4506_v62 }
 0x939   :  { %v3984_v57 = vpop.f32.mrb[24].mxu1 }
 0x93a   :  { %v1367_v44 = vpop.f32.mrb[25].mxu1  ;;  %v4959_v39 = vadd.f32 %v3984_v57, %v3551_v37 }
 0x93b   :  { %v4957_v38 = vadd.f32 %v3551_v37, %v1367_v44 }
 0x93d   :  { %3993 = vmatprep.mubr.msk.f32.mxu1 %vm327_vm2, %v4957_v38 }
 0x93e   :  { %3994 = vmatmul.mubr.msk.f32.vlgmr.msra.gmra.mrb[26].mxu1 %vm327_vm2, %v4959_v39 }
 0x93f   :  { %4008 = vmatprep.mubr.msk.f32.mxu1 %vm4505_vm3, %v4506_v62 }
 0xa11   :  { %v3995_v41 = vpop.f32.mrb[26].mxu1 }
 0xa12   :  { %v1463_v42 = vpop.f32.mrb[27].mxu1  ;;  %v1469_v47 = vadd.f32 %v3995_v41, %v3560_v40 }
 0xa13   :  { %v1464_v45 = vadd.f32 %v3560_v40, %v1463_v42 }
 0xa15   :  { %1473 = vrot.lane.b32.xlu1 %v1464_v45, %s4503_s15 }
 0xa19   :  { %1550 = vrot.lane.b32.xlu1 %v1469_v47, %s4503_s15 }
 0xa87   :  { %v1474_v48 = vpop.permute.xlu1 %1473 }
 0xa88   :  { %3997 = vmatpush3.xpose.msk.msra.mxu0 %vm327_vm2, %v1474_v48 }
 0xa89   :  { %4001 = vmatprep.subr.mxu0 %v4506_v62 }
 0xa8b   :  { %3999 = vmatmul.mubr.msk.f32.vlgmr.msra.gmra.mrb[28].mxu0 %vm327_vm2, %v1464_v45  ;;  %v1551_v49 = vpop.permute.xlu1 %1550 }
 0xa8c   :  { %4002 = vmatpush3.xpose.msk.msra.mxu0 %vm327_vm2, %v1551_v49  ;;  %4003 = vmatprep.mubr.msk.f32.mxu0 %vm4505_vm3, %v4506_v62 }
 0xa8d   :  { %4011 = vmatprep.subr.mxu0 %v4506_v62 }
 0xa8f   :  { %4004 = vmatmul.mubr.msk.f32.vlgmr.msra.gmra.mrb[30].mxu0 %vm327_vm2, %v1469_v47 }
 0xa90   :  { %4013 = vmatprep.mubr.msk.f32.mxu0 %vm4505_vm3, %v4506_v62 }
 0xb5e   :  { %v1545_v50 = vpop.f32.mrb[28].mxu0 }
 0xb5f   :  { %v1626_v51 = vmul.f32 0.17677669, %v1545_v50  ;;  %v4000_v53 = vpop.f32.mrb[29].mxu0 }
 0xb61   :  { %v1629_v56 = vsel %vm1628_vm7, %v1626_v51, -inf }
 0xb62   :  { %1630 = vmax.xlane.f32.xlu0 %v1629_v56  ;;  %v1622_v52 = vpop.f32.mrb[30].mxu0 }
 0xb63   :  { %v1627_v55 = vmul.f32 0.17677669, %v1622_v52  ;;  %v4005_v24 = vpop.f32.mrb[31].mxu0 }
 0xb65   :  { %v1632_v26 = vsel %vm1628_vm7, %v1627_v55, -inf }
 0xb66   :  { %1633 = vmax.xlane.f32.xlu1 %v1632_v26  ;;  %v5023_v26 = vld [vmem:[%s5234_s3 + $0x50] sm:$0xff] }
 0xb77   :  { %1651 = vrot.lane.b32.xlu1 %v1464_v45, %s4509_s9 }
 0xb7b   :  { %4370 = vrot.lane.b32.xlu1 %v4369_v16, %s4507_s0 }
 0xb7f   :  { %4375 = vrot.lane.b32.xlu1 %v4374_v63, %s4507_s0 }
 0xbef   :  { %v1631_v27 = vpop.xlane.xlu0 %1630 }
 0xbf0   :  { %v1635_v60 = vsub.f32 %v1626_v51, %v1631_v27  ;;  %v5028_v27 = vld [vmem:[%s5234_s3 + $0x58] sm:$0xff] }
 0xbf2   :  { %v1637_v11 = vmul.f32 1.442695, %v1635_v60  ;;  %v4254_v60 = vpack.c.bf16 %v5028_v27, %v5023_v26 }
 0xbf3   :  { %v1634_v1 = vpop.xlane.xlu1 %1633 }
 0xbf4   :  { %4427 = vpow2.f32 %v1637_v11  ;;  %v1636_v2 = vsub.f32 %v1627_v55, %v1634_v1  ;;  %v5016_v55 = vld [vmem:[%s5234_s3 + $0x48] sm:$0xff] }
 0xbf6   :  { %v1639_v14 = vmul.f32 1.442695, %v1636_v2 }
 0xbf7   :  { %v1652_v4 = vpop.permute.xlu1 %1651 }
 0xbf8   :  { %4429 = vpow2.f32 %v1639_v14  ;;  %4007 = vmatpush3.msra.mxu1 %v1652_v4 }
 0xbfb   :  { %v4371_v22 = vpop.permute.xlu1 %4370 }
 0xbfc   :  { %v4373_v23 = vunpack.i.h.bf16 %v4371_v22  ;;  %v4372_v10 = vunpack.i.l.bf16 %v4371_v22 }
 0xbfe   :  { %v4428_v34 = vpop.eup %4427  ;;  %v4242_v20 = vpack.c.bf16 %v4373_v23, %v4372_v10 }
 0xbff   :  { %v1641_v8 = vsel %vm1628_vm7, %v4428_v34, 0.0  ;;  %v4376_v3 = vpop.permute.xlu1 %4375 }
 0xc00   :  { %1642 = vadd.xlane.f32.xlu0 %v1641_v8  ;;  %v4378_v15 = vunpack.i.h.bf16 %v4376_v3  ;;  %v4377_v18 = vunpack.i.l.bf16 %v4376_v3  ;;  %4243 = vmatprep.subr.bf16.mxu1 %v4242_v20  ;;  %v3559_v8 = vld [vmem:[%s5236_s5 + $0x2] sm:$0x3] }
 0xc02   :  { %v4430_v9 = vpop.eup %4429  ;;  %v4246_v21 = vpack.c.bf16 %v4378_v15, %v4377_v18 }
 0xc03   :  { %v1644_v12 = vsel %vm1628_vm7, %v4430_v9, 0.0 }
 0xc04   :  { %1645 = vadd.xlane.f32.xlu0 %v1644_v12 }
 0xc1a   :  { %1727 = vrot.lane.b32.xlu0 %v1469_v47, %s4509_s9 }
 0xc1e   :  { %1819 = vrot.lane.b32.xlu0 %v3560_v40, %s4507_s0 }
 0xc8d   :  { %v1643_v17 = vpop.xlane.xlu0 %1642 }
 0xc8e   :  { %4431 = vrcp.f32 %v1643_v17 }
 0xc91   :  { %v1646_v19 = vpop.xlane.xlu0 %1645 }
 0xc92   :  { %4433 = vrcp.f32 %v1646_v19  ;;  %v1940_v19 = vrot.slane %v3559_v8, %v4900_v54 }
 0xc95   :  { %v1728_v13 = vpop.permute.xlu0 %1727 }
 0xc96   :  { %4012 = vmatpush3.msra.mxu0 %v1728_v13 }
 0xc98   :  { %v4432_v5 = vpop.eup %4431 }
 0xc99   :  { %v1649_v7 = vmul.f32 %v4432_v5, %v4428_v34  ;;  %v1820_v33 = vpop.permute.xlu0 %1819 }
 0xc9b   :  { %4009 = vmatmul.mubr.msk.f32.vlgmr.msra.gmra.mrb[28].mxu1 %vm1628_vm7, %v1649_v7 }
 0xc9c   :  { %v4434_v25 = vpop.eup %4433  ;;  %4245 = vmatpush3.bf16.msra.mxu1 %v4242_v20  ;;  %v3577_v20 = vld [vmem:[%s5235_s4 + $0x2] ss:$0 sm:$0xff] }
 0xc9d   :  { %v1650_v28 = vmul.f32 %v4434_v25, %v4430_v9  ;;  %4247 = vmatprep.subr.bf16.mxu1 %v4246_v21  ;;  %v1934_v9 = vrot.slane %v3559_v8, %v4895_v58 }
 0xc9f   :  { %4014 = vmatmul.mubr.msk.f32.vlgmr.msra.gmra.mrb[32].mxu0 %vm1628_vm7, %v1650_v28 }
 0xca0   :  { %4249 = vmatpush3.bf16.msra.mxu1 %v4246_v21 }
 0xca1   :  { %4038 = vmatprep.subr.mxu1 %v4506_v62 }
 0xd6e   :  { %v1723_v29 = vpop.f32.mrb[28].mxu1 }
 0xd6f   :  { %v4010_v30 = vpop.f32.mrb[29].mxu1  ;;  %4024 = vmatprep.mubr.msk.f32.mxu1 %vm327_vm2, %v1723_v29 }
 0xd72   :  { %v1799_v31 = vpop.f32.mrb[32].mxu0 }
 0xd73   :  { %v4015_v32 = vpop.f32.mrb[33].mxu0  ;;  %4025 = vmatmul.mubr.msk.f32.vlgmr.msra.gmra.mrb[30].mxu1 %vm327_vm2, %v1799_v31 }
 0xd74   :  { %4040 = vmatprep.mubr.msk.f32.mxu1 %vm4505_vm3, %v4506_v62 }
 0xe46   :  { %v4026_v35 = vpop.f32.mrb[30].mxu1 }
 0xe47   :  { %v1900_v36 = vadd.f32 %v4026_v35, %v1820_v33  ;;  %v1894_v37 = vpop.f32.mrb[31].mxu1 }
 0xe48   :  { %v1895_v57 = vadd.f32 %v1894_v37, %v1820_v33 }
 0xe49   :  { %v1904_v44 = vadd.f32 %v1900_v36, %v4959_v39 }
 0xe4a   :  { %v1903_v40 = vadd.f32 %v1895_v57, %v4957_v38  ;;  %v5011_v38 = vld [vmem:[%s5234_s3 + $0x40] sm:$0xff] }
 0xe4b   :  { %v1908_v41 = vsel %vm327_vm2, %v1904_v44, 0.0  ;;  %v4250_v24 = vpack.c.bf16 %v5016_v55, %v5011_v38 }
 0xe4c   :  { %1909 = vadd.xlane.f32.xlu0 %v1908_v41  ;;  %v1905_v42 = vsel %vm327_vm2, %v1903_v40, 0.0 }
 0xe4d   :  { %1906 = vadd.xlane.f32.xlu1 %v1905_v42  ;;  %4251 = vmatprep.subr.bf16.mxu0 %v4250_v24 }
 0xe4e   :  { %4253 = vmatpush3.bf16.msra.mxu0 %v4250_v24  ;;  %v5091_v24 = vld [vmem:[%s5234_s3 + $0x70] sm:$0xff] }
 0xe4f   :  { %4255 = vmatprep.subr.bf16.mxu0 %v4254_v60 }
 0xe52   :  { %4257 = vmatpush3.bf16.msra.mxu0 %v4254_v60 }
 0xe53   :  { %4043 = vmatprep.subr.mxu0 %v4506_v62 }
 0xed9   :  { %v1910_v45 = vpop.xlane.xlu0 %1909 }
 0xeda   :  { %v1912_v47 = vmul.f32 0.03125, %v1910_v45  ;;  %v1907_v48 = vpop.xlane.xlu1 %1906 }
 0xedb   :  { %v1911_v49 = vmul.f32 0.03125, %v1907_v48 }
 0xedc   :  { %v1914_v50 = vsub.f32 %v1904_v44, %v1912_v47 }
 0xedd   :  { %v1913_v51 = vsub.f32 %v1903_v40, %v1911_v49  ;;  %v4379_v49 = vpack.i.bf16 %v5016_v55, %v5011_v38 }
 0xede   :  { %v1916_v53 = vmul.f32 %v1914_v50, %v1914_v50 }
 0xedf   :  { %v1915_v56 = vmul.f32 %v1913_v51, %v1913_v51 }
 0xee0   :  { %v1920_v52 = vsel %vm327_vm2, %v1916_v53, 0.0  ;;  %v5084_v53 = vld [vmem:[%s5234_s3 + $0x68] sm:$0xff] }
 0xee1   :  { %1921 = vadd.xlane.f32.xlu1 %v1920_v52  ;;  %v1917_v39 = vsel %vm327_vm2, %v1915_v56, 0.0 }
 0xee2   :  { %1918 = vadd.xlane.f32.xlu0 %v1917_v39 }
 0xf6e   :  { %v1922_v11 = vpop.xlane.xlu1 %1921 }
 0xf6f   :  { %v1924_v1 = vmul.f32 0.03125, %v1922_v11  ;;  %v1919_v2 = vpop.xlane.xlu0 %1918 }
 0xf70   :  { %v1923_v14 = vmul.f32 0.03125, %v1919_v2 }
 0xf71   :  { %v1926_v4 = vadd.f32 1e-05, %v1924_v1 }
 0xf72   :  { %v1925_v34 = vadd.f32 1e-05, %v1923_v14 }
 0xf73   :  { %4435 = vrsqrt.f32 %v1926_v4 }
 0xf74   :  { %4437 = vrsqrt.f32 %v1925_v34 }
 0xf7d   :  { %v4436_v12 = vpop.eup %4435 }
 0xf7e   :  { %v4438_v16 = vpop.eup %4437  ;;  %v1930_v63 = vmul.f32 %v4436_v12, %v1914_v50  ;;  %v4384_v50 = vpack.i.bf16 %v5028_v27, %v5023_v26  ;;  %v5096_v26 = vld [vmem:[%s5234_s3 + $0x78] sm:$0xff] }
 0xf7f   :  { %v1929_v17 = vmul.f32 %v4438_v16, %v1913_v51  ;;  %v5079_v51 = vld [vmem:[%s5234_s3 + $0x60] sm:$0xff]  ;;  %v4270_v1 = vpack.c.bf16 %v5096_v26, %v5091_v24 }
 0xf80   :  { %v1936_v22 = vmul.f32 %v1934_v9, %v1930_v63  ;;  %v4266_v39 = vpack.c.bf16 %v5084_v53, %v5079_v51 }
 0xf81   :  { %v1935_v23 = vmul.f32 %v1934_v9, %v1929_v17 }
 0xf82   :  { %v5040_v13 = vadd.f32 %v1940_v19, %v1936_v22 }
 0xf83   :  { %v5038_v10 = vadd.f32 %v1940_v19, %v1935_v23 }
 0xf85   :  { %4035 = vmatprep.mubr.msk.f32.mxu0 %vm327_vm2, %v5038_v10 }
 0xf86   :  { %4036 = vmatmul.mubr.msk.f32.vlgmr.msra.gmra.mrb[34].mxu0 %vm327_vm2, %v5040_v13 }
 0xf87   :  { %4045 = vmatprep.mubr.msk.f32.mxu0 %vm4505_vm3, %v4506_v62 }
0x1059   :  { %v4037_v3 = vpop.f32.mrb[34].mxu0 }
0x105a   :  { %v2036_v5 = vadd.f32 %v4037_v3, %v3577_v20  ;;  %v2030_v15 = vpop.f32.mrb[35].mxu0 }
0x105b   :  { %v2031_v18 = vadd.f32 %v3577_v20, %v2030_v15 }
0x105c   :  { %2117 = vrot.lane.b32.xlu1 %v2036_v5, %s4503_s15 }
0x105d   :  { %2040 = vrot.lane.b32.xlu0 %v2031_v18, %s4503_s15 }
0x10ce   :  { %v2118_v7 = vpop.permute.xlu1 %2117 }
0x10cf   :  { %4044 = vmatpush3.xpose.msk.msra.mxu0 %vm327_vm2, %v2118_v7  ;;  %v2041_v21 = vpop.permute.xlu0 %2040 }
0x10d0   :  { %4039 = vmatpush3.xpose.msk.msra.mxu1 %vm327_vm2, %v2041_v21  ;;  %4053 = vmatprep.subr.mxu0 %v4506_v62 }
0x10d1   :  { %4048 = vmatprep.subr.mxu1 %v4506_v62 }
0x10d2   :  { %4046 = vmatmul.mubr.msk.f32.vlgmr.msra.gmra.mrb[36].mxu0 %vm327_vm2, %v2036_v5 }
0x10d3   :  { %4041 = vmatmul.mubr.msk.f32.vlgmr.msra.gmra.mrb[32].mxu1 %vm327_vm2, %v2031_v18  ;;  %4055 = vmatprep.mubr.msk.f32.mxu0 %vm4505_vm3, %v4506_v62 }
0x10d4   :  { %4050 = vmatprep.mubr.msk.f32.mxu1 %vm4505_vm3, %v4506_v62 }
0x11a5   :  { %v2189_v25 = vpop.f32.mrb[36].mxu0 }
0x11a6   :  { %v2194_v28 = vmul.f32 0.17677669, %v2189_v25  ;;  %v2112_v29 = vpop.f32.mrb[32].mxu1  ;;  %v4047_v30 = vpop.f32.mrb[37].mxu0 }
0x11a7   :  { %v2193_v31 = vmul.f32 0.17677669, %v2112_v29  ;;  %v4042_v32 = vpop.f32.mrb[33].mxu1 }
0x11a8   :  { %v2198_v33 = vsel %vm1628_vm7, %v2194_v28, -inf }
0x11a9   :  { %2199 = vmax.xlane.f32.xlu0 %v2198_v33  ;;  %v2195_v35 = vsel %vm1628_vm7, %v2193_v31, -inf }
0x11aa   :  { %2196 = vmax.xlane.f32.xlu1 %v2195_v35 }
0x1236   :  { %v2200_v36 = vpop.xlane.xlu0 %2199 }
0x1237   :  { %v2202_v37 = vsub.f32 %v2194_v28, %v2200_v36  ;;  %v2197_v57 = vpop.xlane.xlu1 %2196  ;;  %v5129_v36 = vpack.i.bf16 %v5084_v53, %v5079_v51 }
0x1238   :  { %v2201_v44 = vsub.f32 %v2193_v31, %v2197_v57 }
0x1239   :  { %v2205_v40 = vmul.f32 1.442695, %v2202_v37 }
0x123a   :  { %v2203_v41 = vmul.f32 1.442695, %v2201_v44 }
0x123b   :  { %4439 = vpow2.f32 %v2205_v40 }
0x123c   :  { %4441 = vpow2.f32 %v2203_v41 }
0x1245   :  { %v4440_v42 = vpop.eup %4439 }
0x1246   :  { %v4442_v45 = vpop.eup %4441  ;;  %v2210_v47 = vsel %vm1628_vm7, %v4440_v42, 0.0 }
0x1247   :  { %2211 = vadd.xlane.f32.xlu1 %v2210_v47  ;;  %v2207_v48 = vsel %vm1628_vm7, %v4442_v45, 0.0 }
0x1248   :  { %2208 = vadd.xlane.f32.xlu0 %v2207_v48  ;;  %v5139_v48 = vpack.i.bf16 %v5096_v26, %v5091_v24 }
0x1258   :  { %2293 = vrot.lane.b32.xlu1 %v2036_v5, %s4509_s9 }
0x125c   :  { %4380 = vrot.lane.b32.xlu1 %v4379_v49, %s4507_s0 }
0x125e   :  { %2217 = vrot.lane.b32.xlu0 %v2031_v18, %s4509_s9 }
0x1260   :  { %2385 = vrot.lane.b32.xlu1 %v3577_v20, %s4507_s0  ;;  %v5115_v20 = vld [vmem:[%s5235_s4 + $0x3] ss:$0 sm:$0xff] }
0x1262   :  { %4385 = vrot.lane.b32.xlu0 %v4384_v50, %s4507_s0 }
0x12d4   :  { %v2212_v56 = vpop.xlane.xlu1 %2211 }
0x12d5   :  { %4443 = vrcp.f32 %v2212_v56  ;;  %v2209_v52 = vpop.xlane.xlu0 %2208 }
0x12d6   :  { %4445 = vrcp.f32 %v2209_v52 }
0x12d8   :  { %v2294_v38 = vpop.permute.xlu1 %2293 }
0x12d9   :  { %4054 = vmatpush3.msra.mxu0 %v2294_v38  ;;  %v2218_v55 = vpop.permute.xlu0 %2217 }
0x12da   :  { %4049 = vmatpush3.msra.mxu1 %v2218_v55  ;;  %4267 = vmatprep.subr.bf16.mxu0 %v4266_v39 }
0x12dc   :  { %v4381_v14 = vpop.permute.xlu1 %4380 }
0x12dd   :  { %v4386_v4 = vpop.permute.xlu0 %4385  ;;  %v4383_v34 = vunpack.i.h.bf16 %v4381_v14  ;;  %v4382_v8 = vunpack.i.l.bf16 %v4381_v14 }
0x12de   :  { %v4388_v9 = vunpack.i.h.bf16 %v4386_v4  ;;  %v4387_v12 = vunpack.i.l.bf16 %v4386_v4 }
0x12df   :  { %v4444_v27 = vpop.eup %4443  ;;  %v4258_v16 = vpack.c.bf16 %v4383_v34, %v4382_v8 }
0x12e0   :  { %v4446_v60 = vpop.eup %4445  ;;  %v2216_v11 = vmul.f32 %v4444_v27, %v4440_v42  ;;  %v4262_v63 = vpack.c.bf16 %v4388_v9, %v4387_v12  ;;  %v2386_v21 = vpop.permute.xlu1 %2385 }
0x12e1   :  { %v2215_v2 = vmul.f32 %v4446_v60, %v4442_v45  ;;  %4259 = vmatprep.subr.bf16.mxu1 %v4258_v16 }
0x12e2   :  { %4056 = vmatmul.mubr.msk.f32.vlgmr.msra.gmra.mrb[38].mxu0 %vm1628_vm7, %v2216_v11 }
0x12e3   :  { %4269 = vmatpush3.bf16.msra.mxu0 %v4266_v39  ;;  %4051 = vmatmul.mubr.msk.f32.vlgmr.msra.gmra.mrb[34].mxu1 %vm1628_vm7, %v2215_v2 }
0x12e4   :  { %4077 = vmatprep.mubr.msk.f32.mxu0 %vm327_vm2, %v4697_v43  ;;  %4271 = vmatprep.subr.bf16.mxu0 %v4270_v1 }
0x12e5   :  { %4261 = vmatpush3.bf16.msra.mxu1 %v4258_v16 }
0x12e6   :  { %4263 = vmatprep.subr.bf16.mxu1 %v4262_v63 }
0x12e7   :  { %4273 = vmatpush3.bf16.msra.mxu0 %v4270_v1  ;;  %v3576_v1 = vld [vmem:[%s5236_s5 + $0x4] sm:$0x3] }
0x12e8   :  { %v2500_v4 = vrot.slane %v3576_v1, %v4895_v58  ;;  %v2506_v12 = vrot.slane %v3576_v1, %v4900_v54 }
0x12e9   :  { %4265 = vmatpush3.bf16.msra.mxu1 %v4262_v63 }
0x12ea   :  { %4078 = vmatmul.mubr.msk.f32.vlgmr.msra.gmra.mrb[40].mxu0 %vm327_vm2, %v4703_v46 }
0x12eb   :  { %4080 = vmatprep.mubr.msk.f32.mxu0 %vm327_vm2, %v4825_v0 }
0x12ee   :  { %4081 = vmatmul.mubr.msk.f32.gmra.mrb[42].mxu0 %vm327_vm2, %v4823_v61 }
0x13b5   :  { %v2365_v17 = vpop.f32.mrb[38].mxu0 }
0x13b6   :  { %v2289_v19 = vpop.f32.mrb[34].mxu1  ;;  %v4057_v22 = vpop.f32.mrb[39].mxu0 }
0x13b7   :  { %v4052_v23 = vpop.f32.mrb[35].mxu1  ;;  %4066 = vmatprep.mubr.msk.f32.mxu1 %vm327_vm2, %v2289_v19 }
0x13b8   :  { %4067 = vmatmul.mubr.msk.f32.vlgmr.msra.gmra.mrb[36].mxu1 %vm327_vm2, %v2365_v17 }
0x13bd   :  { %v5117_v3 = vpop.f32.mrb[40].mxu0 }
0x13be   :  { %v2602_v5 = vpop.f32.mrb[41].mxu0 }
0x13bf   :  { %v2603_v15 = vadd.f32 %v5115_v20, %v2602_v5 }
0x13c1   :  { %v5120_v18 = vpop.f32.mrb[42].mxu0  ;;  %4096 = vmatprep.mubr.msk.f32.mxu0 %vm327_vm2, %v2603_v15 }
0x13c2   :  { %v2612_v7 = vpop.f32.mrb[43].mxu0 }
0x13c3   :  { %v2613_v19 = vadd.f32 %v5115_v20, %v2612_v7  ;;  %v2618_v7 = vadd.f32 %v5120_v18, %v5115_v20 }
0x148b   :  { %v4068_v25 = vpop.f32.mrb[36].mxu1 }
0x148c   :  { %v2466_v28 = vadd.f32 %v4068_v25, %v2386_v21  ;;  %v2460_v29 = vpop.f32.mrb[37].mxu1  ;;  %v2608_v25 = vadd.f32 %v5117_v3, %v5115_v20 }
0x148d   :  { %v2461_v30 = vadd.f32 %v2460_v29, %v2386_v21 }
0x148e   :  { %v2470_v31 = vadd.f32 %v2466_v28, %v5040_v13 }
0x148f   :  { %v2469_v32 = vadd.f32 %v2461_v30, %v5038_v10 }
0x1490   :  { %v2474_v33 = vsel %vm327_vm2, %v2470_v31, 0.0 }
0x1491   :  { %2475 = vadd.xlane.f32.xlu1 %v2474_v33  ;;  %v2471_v35 = vsel %vm327_vm2, %v2469_v32, 0.0 }
0x1492   :  { %2472 = vadd.xlane.f32.xlu0 %v2471_v35 }
0x14a2   :  { %4390 = vrot.lane.b32.xlu1 %v5129_v36, %s4503_s15 }
0x14a6   :  { %2637 = vrot.lane.b32.xlu1 %v5115_v20, %s4503_s15 }
0x151e   :  { %v2476_v37 = vpop.xlane.xlu1 %2475 }
0x151f   :  { %v2478_v13 = vmul.f32 0.03125, %v2476_v37  ;;  %v2473_v57 = vpop.xlane.xlu0 %2472 }
0x1520   :  { %v2477_v10 = vmul.f32 0.03125, %v2473_v57 }
0x1521   :  { %v2480_v44 = vsub.f32 %v2470_v31, %v2478_v13 }
0x1522   :  { %v2479_v40 = vsub.f32 %v2469_v32, %v2477_v10  ;;  %v4391_v49 = vpop.permute.xlu1 %4390 }
0x1523   :  { %v2482_v41 = vmul.f32 %v2480_v44, %v2480_v44  ;;  %v4393_v50 = vunpack.i.h.bf16 %v4391_v49  ;;  %v4392_v51 = vunpack.i.l.bf16 %v4391_v49 }
0x1524   :  { %v2481_v45 = vmul.f32 %v2479_v40, %v2479_v40 }
0x1525   :  { %v2486_v42 = vsel %vm327_vm2, %v2482_v41, 0.0  ;;  %v4274_v53 = vpack.c.bf16 %v4393_v50, %v4392_v51 }
0x1526   :  { %2487 = vadd.xlane.f32.xlu0 %v2486_v42  ;;  %v2483_v47 = vsel %vm327_vm2, %v2481_v45, 0.0  ;;  %v2638_v22 = vpop.permute.xlu1 %2637 }
0x1527   :  { %4275 = vmatprep.subr.bf16.mxu1 %v4274_v53 }
0x1528   :  { %4277 = vmatpush3.bf16.msra.mxu1 %v4274_v53 }
0x152a   :  { %2484 = vadd.xlane.f32.xlu0 %v2483_v47 }
0x1540   :  { %4395 = vrot.lane.b32.xlu0 %v5139_v48, %s4503_s15 }
0x15b3   :  { %v2488_v56 = vpop.xlane.xlu0 %2487 }
0x15b4   :  { %v2490_v52 = vmul.f32 0.03125, %v2488_v56 }
0x15b6   :  { %v2492_v39 = vadd.f32 1e-05, %v2490_v52 }
0x15b7   :  { %v2485_v38 = vpop.xlane.xlu0 %2484 }
0x15b8   :  { %4447 = vrsqrt.f32 %v2492_v39  ;;  %v2489_v55 = vmul.f32 0.03125, %v2485_v38 }
0x15ba   :  { %v2491_v27 = vadd.f32 1e-05, %v2489_v55 }
0x15bb   :  { %v4396_v60 = vpop.permute.xlu0 %4395 }
0x15bc   :  { %4449 = vrsqrt.f32 %v2491_v27  ;;  %v4398_v24 = vunpack.i.h.bf16 %v4396_v60  ;;  %v4397_v26 = vunpack.i.l.bf16 %v4396_v60 }
0x15be   :  { %v4278_v11 = vpack.c.bf16 %v4398_v24, %v4397_v26 }
0x15c0   :  { %4279 = vmatprep.subr.bf16.mxu1 %v4278_v11 }
0x15c1   :  { %4281 = vmatpush3.bf16.msra.mxu1 %v4278_v11 }
0x15c2   :  { %v4448_v2 = vpop.eup %4447 }
0x15c3   :  { %v2496_v14 = vmul.f32 %v4448_v2, %v2480_v44 }
0x15c5   :  { %v2502_v9 = vmul.f32 %v2500_v4, %v2496_v14 }
0x15c6   :  { %v4450_v34 = vpop.eup %4449 }
0x15c7   :  { %v2495_v8 = vmul.f32 %v4450_v34, %v2479_v40  ;;  %v2508_v17 = vadd.f32 %v2506_v12, %v2502_v9 }
0x15c9   :  { %v2501_v16 = vmul.f32 %v2500_v4, %v2495_v8 }
0x15cb   :  { %v2507_v63 = vadd.f32 %v2506_v12, %v2501_v16 }
0x15cd   :  { %4091 = vmatprep.mubr.msk.f32.mxu1 %vm327_vm2, %v2507_v63 }
0x15ce   :  { %4092 = vmatmul.mubr.msk.f32.vlgmr.msra.gmra.mrb[38].mxu1 %vm327_vm2, %v2508_v17 }
0x15cf   :  { %4101 = vmatprep.mubr.msk.f32.mxu1 %vm327_vm2, %v2613_v19 }
0x16a1   :  { %v4093_v23 = vpop.f32.mrb[38].mxu1 }
0x16a2   :  { %v2718_v5 = vadd.f32 %v4093_v23, %v2638_v22  ;;  %v2712_v15 = vpop.f32.mrb[39].mxu1 }
0x16a3   :  { %v2713_v21 = vadd.f32 %v2712_v15, %v2638_v22 }
0x16a4   :  { %4099 = vmatprep.subr.msk.mxu1 %vm327_vm2, %v2718_v5 }
0x16a5   :  { %4094 = vmatprep.subr.msk.mxu0 %vm327_vm2, %v2713_v21  ;;  %4100 = vmatpush3.xpose.msk.msra.mxu1 %vm327_vm2, %v2718_v5 }
0x16a6   :  { %4095 = vmatpush3.xpose.msk.msra.mxu0 %vm327_vm2, %v2713_v21 }
0x16a8   :  { %4102 = vmatmul.mubr.msk.f32.vlgmr.msra.gmra.mrb[40].mxu1 %vm327_vm2, %v2618_v7 }
0x16a9   :  { %4097 = vmatmul.mubr.msk.f32.vlgmr.msra.gmra.mrb[44].mxu0 %vm327_vm2, %v2608_v25 }
0x177b   :  { %v4103_v28 = vpop.f32.mrb[40].mxu1 }
0x177c   :  { %v4098_v29 = vpop.f32.mrb[44].mxu0  ;;  %v2880_v30 = vpop.f32.mrb[41].mxu1  ;;  %v2892_v13 = vmul.f32 0.17677669, %v4103_v28 }
0x177d   :  { %v2890_v31 = vmul.f32 0.17677669, %v4098_v29  ;;  %v2796_v32 = vpop.f32.mrb[45].mxu0  ;;  %v2891_v35 = vmul.f32 0.17677669, %v2880_v30 }
0x177e   :  { %v2889_v33 = vmul.f32 0.17677669, %v2796_v32  ;;  %v2902_v57 = vsel %vm1628_vm7, %v2892_v13, -inf }
0x177f   :  { %v2896_v37 = vsel %vm1628_vm7, %v2890_v31, -inf  ;;  %v2899_v3 = vsel %vm1628_vm7, %v2891_v35, -inf }
0x1780   :  { %2897 = vmax.xlane.f32.xlu0 %v2896_v37  ;;  %v2893_v18 = vsel %vm1628_vm7, %v2889_v33, -inf }
0x1781   :  { %2894 = vmax.xlane.f32.xlu1 %v2893_v18 }
0x1784   :  { %2900 = vmax.xlane.f32.xlu0 %v2899_v3 }
0x1785   :  { %2903 = vmax.xlane.f32.xlu1 %v2902_v57 }
0x180d   :  { %v2898_v10 = vpop.xlane.xlu0 %2897 }
0x180e   :  { %v2895_v44 = vpop.xlane.xlu1 %2894  ;;  %v2906_v41 = vsub.f32 %v2890_v31, %v2898_v10 }
0x180f   :  { %v2905_v40 = vsub.f32 %v2889_v33, %v2895_v44 }
0x1810   :  { %v2911_v53 = vmul.f32 1.442695, %v2906_v41 }
0x1811   :  { %v2901_v42 = vpop.xlane.xlu0 %2900  ;;  %v2909_v50 = vmul.f32 1.442695, %v2905_v40 }
0x1812   :  { %v2907_v45 = vsub.f32 %v2891_v35, %v2901_v42  ;;  %v2904_v47 = vpop.xlane.xlu1 %2903 }
0x1813   :  { %v2908_v49 = vsub.f32 %v2892_v13, %v2904_v47 }
0x1814   :  { %v2913_v51 = vmul.f32 1.442695, %v2907_v45 }
0x1815   :  { %v2915_v56 = vmul.f32 1.442695, %v2908_v49 }
0x1816   :  { %4451 = vpow2.f32 %v2913_v51 }
0x1817   :  { %4453 = vpow2.f32 %v2915_v56 }
0x1818   :  { %4455 = vpow2.f32 %v2909_v50 }
0x1819   :  { %4457 = vpow2.f32 %v2911_v53 }
0x1820   :  { %v4452_v52 = vpop.eup %4451 }
0x1821   :  { %v4454_v39 = vpop.eup %4453  ;;  %v2923_v38 = vsel %vm1628_vm7, %v4452_v52, 0.0 }
0x1822   :  { %v4456_v55 = vpop.eup %4455  ;;  %2924 = vadd.xlane.f32.xlu0 %v2923_v38  ;;  %v2926_v27 = vsel %vm1628_vm7, %v4454_v39, 0.0 }
0x1823   :  { %v4458_v60 = vpop.eup %4457  ;;  %2927 = vadd.xlane.f32.xlu1 %v2926_v27  ;;  %v2917_v24 = vsel %vm1628_vm7, %v4456_v55, 0.0 }
0x1824   :  { %v2920_v26 = vsel %vm1628_vm7, %v4458_v60, 0.0 }
0x1826   :  { %2918 = vadd.xlane.f32.xlu0 %v2917_v24 }
0x1827   :  { %2921 = vadd.xlane.f32.xlu1 %v2920_v26 }
0x1838   :  { %3021 = vrot.lane.b32.xlu1 %v2718_v5, %s4503_s15 }
0x183c   :  { %2937 = vrot.lane.b32.xlu0 %v2713_v21, %s4503_s15  ;;  %4400 = vrot.lane.b32.xlu1 %v5129_v36, %s4507_s0 }
0x1840   :  { %4405 = vrot.lane.b32.xlu0 %v5139_v48, %s4507_s0  ;;  %3117 = vrot.lane.b32.xlu1 %v5115_v20, %s4507_s0 }
0x18af   :  { %v2925_v11 = vpop.xlane.xlu0 %2924 }
0x18b0   :  { %4459 = vrcp.f32 %v2925_v11  ;;  %v2928_v1 = vpop.xlane.xlu1 %2927 }
0x18b1   :  { %4461 = vrcp.f32 %v2928_v1 }
0x18b3   :  { %v2919_v2 = vpop.xlane.xlu0 %2918 }
0x18b4   :  { %4463 = vrcp.f32 %v2919_v2  ;;  %v2922_v14 = vpop.xlane.xlu1 %2921  ;;  %v3290_v2 = vld [vmem:[#allocation2] sm:$0x1] }
0x18b5   :  { %4465 = vrcp.f32 %v2922_v14  ;;  %v4510_v14 = vmov 0  }
0x18b6   :  { %4409 = vset.pattern.permute.xlu1 %v4510_v14  ;;  %4410 = vset.pattern.permute.xlu0 %v4510_v14 }
0x18b7   :  { %v2938_v4 = vpop.permute.xlu0 %2937 }
0x18b8   :  { %4104 = vmatprep.subr.mxu0 %v2938_v4  ;;  %v3022_v34 = vpop.permute.xlu1 %3021 }
0x18b9   :  { %4105 = vmatpush3.msra.mxu0 %v2938_v4  ;;  %4109 = vmatprep.subr.mxu1 %v3022_v34 }
0x18ba   :  { %v4460_v36 = vpop.eup %4459  ;;  %4110 = vmatpush3.msra.mxu1 %v3022_v34 }
0x18bb   :  { %v4462_v8 = vpop.eup %4461  ;;  %v2935_v48 = vmul.f32 %v4460_v36, %v4452_v52  ;;  %v4406_v9 = vpop.permute.xlu0 %4405  ;;  %4290 = vmatprep.subr.bf16.mxu1 %v4504_v59 }
0x18bc   :  { %v2936_v20 = vmul.f32 %v4462_v8, %v4454_v39  ;;  %v4401_v12 = vpop.permute.xlu1 %4400  ;;  %v4408_v16 = vunpack.i.h.bf16 %v4406_v9  ;;  %v4407_v63 = vunpack.i.l.bf16 %v4406_v9 }
0x18bd   :  { %4111 = vmatprep.mubr.msk.f32.mxu1 %vm1628_vm7, %v2935_v48  ;;  %v4403_v17 = vunpack.i.h.bf16 %v4401_v12  ;;  %v4402_v19 = vunpack.i.l.bf16 %v4401_v12 }
0x18be   :  { %v4464_v22 = vpop.eup %4463  ;;  %4112 = vmatmul.mubr.msk.f32.vlgmr.msra.gmra.mrb[42].mxu1 %vm1628_vm7, %v2936_v20  ;;  %v4286_v7 = vpack.c.bf16 %v4408_v16, %v4407_v63 }
0x18bf   :  { %v4466_v23 = vpop.eup %4465  ;;  %v2933_v5 = vmul.f32 %v4464_v22, %v4456_v55  ;;  %v4282_v15 = vpack.c.bf16 %v4403_v17, %v4402_v19  ;;  %4132 = vmatprep.mubr.msk.f32.mxu1 %vm4505_vm3, %v4506_v62  ;;  %v3593_v19 = vld [vmem:[%s5236_s5 + $0x6] sm:$0x3] }
0x18c0   :  { %v2934_v21 = vmul.f32 %v4466_v23, %v4458_v60  ;;  %v3118_v31 = vpop.permute.xlu1 %3117  ;;  %v3276_v23 = vrot.slane %v3593_v19, %v4895_v58 }
0x18c1   :  { %4106 = vmatprep.mubr.msk.f32.mxu0 %vm1628_vm7, %v2933_v5  ;;  %4283 = vmatprep.subr.bf16.mxu0 %v4282_v15 }
0x18c2   :  { %4107 = vmatmul.mubr.msk.f32.vlgmr.msra.gmra.mrb[46].mxu0 %vm1628_vm7, %v2934_v21 }
0x18c3   :  { %4285 = vmatpush3.bf16.msra.mxu0 %v4282_v15 }
0x18c4   :  { %4287 = vmatprep.subr.bf16.mxu0 %v4286_v7 }
0x18c7   :  { %4289 = vmatpush3.bf16.msra.mxu0 %v4286_v7  ;;  %v3284_v7 = vrot.slane %v3593_v19, %v4900_v54  ;;  %v3289_v54 = vld [vmem:[%s5241_s10] sm:$0x1]  ;;  %s4511_s10 = smov [#allocation3]  }
0x18c8   :  { %4294 = vmatprep.subr.bf16.mxu0 %v4504_v59  ;;  %s3471_s9 = sshll.u32 %s4511_s10, 4  ;;  %s3472_s9 = int_to_ptr.vmem [resolvable:$true] %s3471_s9 }
0x18c9   :  { %s4479_s23 = scalar_lea.vmem %s3472_s9, 32  ;;  %p4484_p1 = scmp.lt.s32.totalorder %s3472_s9, %s3472_s9 }
0x18ca   :  { %p4480_p0 = scmp.ne.s32.totalorder %s3472_s9, %s4479_s23  ;;  %p4485_p2 = scmp.lt.s32.totalorder %s4479_s23, %s4479_s23 }
0x18cc   :  { %p4486_p3 = por %p4485_p2, %p4484_p1 }
0x18ce   :  { %p4487_p4 = pnand %p4486_p3, %p4480_p0 }
0x1991   :  { %v4113_v25 = vpop.f32.mrb[42].mxu1 }
0x1992   :  { %v3096_v28 = vpop.f32.mrb[43].mxu1 }
0x1995   :  { %v4108_v29 = vpop.f32.mrb[46].mxu0 }
0x1996   :  { %v3012_v30 = vpop.f32.mrb[47].mxu0 }
0x1997   :  { %4122 = vmatprep.mubr.msk.f32.mxu0 %vm327_vm2, %v3012_v30 }
0x1998   :  { %4123 = vmatmul.mubr.msk.f32.vlgmr.msra.gmra.mrb[48].mxu0 %vm327_vm2, %v4108_v29 }
0x1999   :  { %4125 = vmatprep.mubr.msk.f32.mxu0 %vm327_vm2, %v3096_v28 }
0x199c   :  { %4126 = vmatmul.mubr.msk.f32.gmra.mrb[50].mxu0 %vm327_vm2, %v4113_v25 }
0x199d   :  { %4139 = vmatprep.mubr.msk.f32.mxu0 %vm4505_vm3, %v4506_v62 }
0x1a6b   :  { %v4124_v32 = vpop.f32.mrb[48].mxu0 }
0x1a6c   :  { %v3204_v33 = vadd.f32 %v4124_v32, %v3118_v31  ;;  %v3198_v35 = vpop.f32.mrb[49].mxu0 }
0x1a6d   :  { %v3199_v59 = vadd.f32 %v3198_v35, %v3118_v31 }
0x1a6e   :  { %v3218_v37 = vadd.f32 %v3204_v33, %v4703_v46 }
0x1a6f   :  { %v4127_v13 = vpop.f32.mrb[50].mxu0  ;;  %v3217_v18 = vadd.f32 %v4697_v43, %v3199_v59 }
0x1a70   :  { %v3214_v3 = vadd.f32 %v4127_v13, %v3118_v31  ;;  %v3208_v57 = vpop.f32.mrb[51].mxu0  ;;  %v3224_v10 = vsel %vm327_vm2, %v3218_v37, 0.0 }
0x1a71   :  { %v3209_v44 = vadd.f32 %v3208_v57, %v3118_v31  ;;  %3225 = vadd.xlane.f32.xlu1 %v3224_v10  ;;  %v3221_v40 = vsel %vm327_vm2, %v3217_v18, 0.0 }
0x1a72   :  { %3222 = vadd.xlane.f32.xlu0 %v3221_v40  ;;  %v3220_v62 = vadd.f32 %v4823_v61, %v3214_v3 }
0x1a73   :  { %v3219_v41 = vadd.f32 %v3209_v44, %v4825_v0 }
0x1a74   :  { %v3230_v46 = vsel %vm327_vm2, %v3220_v62, 0.0 }
0x1a75   :  { %v3227_v42 = vsel %vm327_vm2, %v3219_v41, 0.0 }
0x1a76   :  { %3228 = vadd.xlane.f32.xlu0 %v3227_v42 }
0x1a7a   :  { %3231 = vadd.xlane.f32.xlu0 %v3230_v46 }
0x1afe   :  { %v3226_v43 = vpop.xlane.xlu1 %3225 }
0x1aff   :  { %v3234_v45 = vmul.f32 0.03125, %v3226_v43  ;;  %v3223_v47 = vpop.xlane.xlu0 %3222 }
0x1b00   :  { %v3233_v49 = vmul.f32 0.03125, %v3223_v47 }
0x1b01   :  { %v3238_v50 = vsub.f32 %v3218_v37, %v3234_v45 }
0x1b02   :  { %v3237_v51 = vsub.f32 %v3217_v18, %v3233_v49 }
0x1b03   :  { %v3229_v53 = vpop.xlane.xlu0 %3228  ;;  %v3242_v56 = vmul.f32 %v3238_v50, %v3238_v50 }
0x1b04   :  { %v3235_v52 = vmul.f32 0.03125, %v3229_v53  ;;  %v3241_v39 = vmul.f32 %v3237_v51, %v3237_v51 }
0x1b05   :  { %v3248_v61 = vsel %vm327_vm2, %v3242_v56, 0.0 }
0x1b06   :  { %v3239_v38 = vsub.f32 %v3219_v41, %v3235_v52  ;;  %3249 = vadd.xlane.f32.xlu0 %v3248_v61  ;;  %v3245_v0 = vsel %vm327_vm2, %v3241_v39, 0.0 }
0x1b07   :  { %3246 = vadd.xlane.f32.xlu1 %v3245_v0  ;;  %v3232_v55 = vpop.xlane.xlu0 %3231 }
0x1b08   :  { %v3236_v27 = vmul.f32 0.03125, %v3232_v55  ;;  %v3243_v60 = vmul.f32 %v3239_v38, %v3239_v38 }
0x1b0a   :  { %v3240_v24 = vsub.f32 %v3220_v62, %v3236_v27  ;;  %v3251_v26 = vsel %vm327_vm2, %v3243_v60, 0.0 }
0x1b0b   :  { %3252 = vadd.xlane.f32.xlu1 %v3251_v26 }
0x1b0c   :  { %v3244_v11 = vmul.f32 %v3240_v24, %v3240_v24 }
0x1b0e   :  { %v3254_v1 = vsel %vm327_vm2, %v3244_v11, 0.0 }
0x1b0f   :  { %3255 = vadd.xlane.f32.xlu0 %v3254_v1 }
0x1b1c   :  { %3293 = vperm.xlu1 %4409, %v3290_v2  }
0x1b93   :  { %v3250_v4 = vpop.xlane.xlu0 %3249 }
0x1b94   :  { %v3258_v34 = vmul.f32 0.03125, %v3250_v4  ;;  %v3247_v36 = vpop.xlane.xlu1 %3246 }
0x1b95   :  { %v3257_v8 = vmul.f32 0.03125, %v3247_v36 }
0x1b96   :  { %v3262_v48 = vadd.f32 1e-05, %v3258_v34 }
0x1b97   :  { %v3261_v9 = vadd.f32 1e-05, %v3257_v8 }
0x1b98   :  { %4467 = vrsqrt.f32 %v3262_v48  ;;  %v3253_v20 = vpop.xlane.xlu1 %3252 }
0x1b99   :  { %4469 = vrsqrt.f32 %v3261_v9  ;;  %v3259_v12 = vmul.f32 0.03125, %v3253_v20 }
0x1b9b   :  { %v3263_v16 = vadd.f32 1e-05, %v3259_v12 }
0x1b9c   :  { %v3256_v63 = vpop.xlane.xlu0 %3255  ;;  %v3294_v44 = vpop.permute.xlu1 %3293 }
0x1b9d   :  { %4471 = vrsqrt.f32 %v3263_v16  ;;  %v3260_v17 = vmul.f32 0.03125, %v3256_v63  ;;  %v3299_v40 = vrot.slane %v3294_v44, %v4895_v58 }
0x1b9f   :  { %v3264_v22 = vadd.f32 1e-05, %v3260_v17 }
0x1ba1   :  { %4473 = vrsqrt.f32 %v3264_v22 }
0x1ba2   :  { %v4468_v5 = vpop.eup %4467 }
0x1ba3   :  { %v4470_v15 = vpop.eup %4469  ;;  %v3270_v21 = vmul.f32 %v4468_v5, %v3238_v50 }
0x1ba4   :  { %v3269_v25 = vmul.f32 %v4470_v15, %v3237_v51 }
0x1ba5   :  { %v3278_v28 = vmul.f32 %v3276_v23, %v3270_v21 }
0x1ba6   :  { %v3277_v29 = vmul.f32 %v3276_v23, %v3269_v25 }
0x1ba7   :  { %v4472_v30 = vpop.eup %4471  ;;  %v3286_v31 = vadd.f32 %v3284_v7, %v3278_v28 }
0x1ba8   :  { %v3271_v32 = vmul.f32 %v4472_v30, %v3239_v38  ;;  %v3285_v33 = vadd.f32 %v3284_v7, %v3277_v29 }
0x1baa   :  { %v4291_v35 = vpack.c.bf16 %v3286_v31, %v3285_v33  ;;  %v3279_v37 = vmul.f32 %v3276_v23, %v3271_v32 }
0x1bab   :  { %v4474_v59 = vpop.eup %4473 }
0x1bac   :  { %v3272_v13 = vmul.f32 %v4474_v59, %v3240_v24  ;;  %4293 = vmatpush3.bf16.xpose.msk.msra.mxu1 %vm4749_vm4, %v4291_v35  ;;  %v3287_v3 = vadd.f32 %v3284_v7, %v3279_v37 }
0x1bae   :  { %v3280_v18 = vmul.f32 %v3276_v23, %v3272_v13 }
0x1bb0   :  { %v3288_v57 = vadd.f32 %v3284_v7, %v3280_v18 }
0x1bb2   :  { %v4295_v10 = vpack.c.bf16 %v3288_v57, %v3287_v3 }
0x1bb3   :  { %4133 = vmatmul.mubr.msk.f32.vlgmr.msra.gmra.mrb[44].mxu1 %vm327_vm2, %v3289_v54 }
0x1bb4   :  { %4297 = vmatpush3.bf16.xpose.msk.msra.mxu0 %vm4749_vm4, %v4295_v10 }
0x1bbb   :  { %4140 = vmatmul.mubr.msk.f32.vlgmr.msra.gmra.mrb[52].mxu0 %vm327_vm2, %v3289_v54 }
0x1c86   :  { %v3375_v62 = vpop.f32.mrb[44].mxu1 }
0x1c87   :  { %v3376_v41 = vadd.f32 %v3375_v62, %v3299_v40  ;;  %v4134_v42 = vpop.f32.mrb[45].mxu1 }
0x1c89   :  { %4475 = vtanh.f32 %v3376_v41 }
0x1c8e   :  { %v3451_v46 = vpop.f32.mrb[52].mxu0 }
0x1c8f   :  { %v3452_v43 = vadd.f32 %v3451_v46, %v3299_v40  ;;  %v4141_v45 = vpop.f32.mrb[53].mxu0 }
0x1c91   :  { %4477 = vtanh.f32 %v3452_v43 }
0x1c93   :  { %v4476_v47 = vpop.eup %4475 }
0x1c94   :  { %v3457_v49 = vmul.f32 0.5, %v4476_v47 }
0x1c96   :  { %v3459_v50 = vadd.f32 0.5, %v3457_v49 }
0x1c98   :  { %3462 = vst.msk [vmem:[#allocation3] sm:$0x1] %vm3461_vm8, %v3459_v50 }
0x1c9b   :  { %v4478_v6 = vpop.eup %4477 }
0x1c9c   :  { %v3458_v51 = vmul.f32 0.5, %v4478_v6 }
0x1c9e   :  { %v3460_v53 = vadd.f32 0.5, %v3458_v51 }
0x1ca0   :  { %3463 = vst.msk [vmem:[#allocation3 + $0x1] sm:$0x1] %vm3461_vm8, %v3460_v53 }
0x1ca1   :  { %4490 = shalt.err (!%p4487_p4)
}
0x1ca2   :  { %s4491_s26 = scalar_lea.hbm %s5244_s13, 32 }
0x1ca3   :  { %p4492_p5 = scmp.ne.s32.totalorder %s5244_s13, %s4491_s26  ;;  %p4495_p6 = scmp.lt.u32.totalorder %s4491_s26, %s5244_s13 }
0x1ca5   :  { %p4497_p7 = pnand %p4495_p6, %p4492_p5 }
0x1ca7   :  { %4500 = shalt.err (!%p4497_p7)
}
0x1ca8   :  { %s4512_s12 = smov 16   ;;  %s4513_s30 = smov 1  }
0x1ca9   :  { %3477 = dma.vmem_to_hbm [thread:$0]  %s3472_s9, 32, %s5244_s13, [#allocation4], %s4512_s12, %s4512_s12, %s4513_s30  }
0x1caa   :  { %4501 = dma.done.wait [#allocation4], 32  }
0x1cab   :  { %4502 = vsyncadd [#allocation4], 4294967264 }
0x1cac   :  { %3483 = vsyncpa [#allocation4], 1 }

</bundles_post_ra>
